<compile_context>
chip_gen: v7x
topology: tpu7x:2x2x1
jax: 0.10.0
libtpu: 0.0.40
codegen_flags: <defaults>
</compile_context>

<pallas_src>
import functools

import jax
import jax.numpy as jnp
from jax import lax
from jax.experimental import pallas as pl
from jax.experimental.pallas import tpu as pltpu

_LANE = 128
_SUBLANE = 8


def _cdiv(a, b):
    return -(-a // b)


def _rup(a, b):
    return _cdiv(a, b) * b


def _vmem_capacity_bytes():
    """Physical VMEM per TensorCore (128 MiB v5e/v6e, 64 MiB v7x); conservative fallback."""
    try:
        info = pltpu.get_tpu_info()
        for name in ("vmem_capacity_bytes", "vmem_bytes", "vmem_size_bytes"):
            v = getattr(info, name, None)
            if v:
                return int(v)
    except Exception:
        pass
    return 64 * 1024 * 1024


def _sepconv_kernel(xb_ref, xt_ref, wdw_ref, wpw_ref, bias_ref, out_ref, *,
                    H_blk, W_out_p, ksize, dilation, halo, mxu_dtype):
    # xb_ref:   (1, H_blk, Wp, Cin_p)         input row block (compute dtype)
    # xt_ref:   (1, max(halo,1), Wp, Cin_p)   halo rows just below the block (same HBM array)
    # wdw_ref:  (k*k, Cin_p)                  BN-scale-folded depthwise weights (f32)
    # wpw_ref:  (Cin_p, Cout_p)               pointwise weights (MXU operand dtype)
    # bias_ref: (1, Cout_p)                   folded BN bias pushed through the pointwise conv (f32)
    # out_ref:  (1, 1, H_blk*W_out_p, Cout_p) lane-dense output block
    body = xb_ref[0]                                        # (H_blk, Wp, Cin_p)
    if halo > 0:
        xp = jnp.concatenate([body, xt_ref[0]], axis=0)     # (H_blk+halo, Wp, Cin_p)
    else:
        xp = body
    wdw = wdw_ref[...]                                      # (k*k, Cin_p) f32

    # Depthwise conv.  Only k sublane-misaligned W slices total (one per kw tap, on the
    # full-height block); all kh slices are cheap major-dim slices.  Accumulate in f32 on
    # the VPU (bf16 input is upcast by the f32 weight multiply), init from tap 0.
    acc = None
    for kw in range(ksize):
        xw = xp[:, kw * dilation:kw * dilation + W_out_p, :]    # (H_blk+halo, W_out_p, Cin_p)
        for kh in range(ksize):
            tap = xw[kh * dilation:kh * dilation + H_blk] * wdw[kh * ksize + kw]   # f32
            acc = tap if acc is None else acc + tap

    # Pointwise 1x1 conv on the MXU: (H_blk*W_out_p, Cin_p) @ (Cin_p, Cout_p), f32 accum.
    a2d = acc.reshape(H_blk * W_out_p, acc.shape[-1]).astype(mxu_dtype)
    z = jnp.dot(a2d, wpw_ref[...], preferred_element_type=jnp.float32)
    z = z + bias_ref[0]                                     # folded BN bias
    out_ref[0, 0] = z.astype(out_ref.dtype)


def _pick_row_block(H_out, W_out_p, halo, row_bytes, fixed_bytes, budget_bytes):
    """Largest halo-aligned output-row block whose working set fits the VMEM budget."""
    align = max(halo, 1)
    avail = max(budget_bytes - fixed_bytes, row_bytes * align)
    max_rows = max(align, (avail // row_bytes) // align * align)
    max_rows = min(max_rows, 512)
    min_rows = _rup(max(1, _cdiv(256, W_out_p)), align)     # fill the MXU M dim (>= 256)
    full = _rup(max(H_out, 1), align)
    half = _rup(_cdiv(max(H_out, 1), 2), align)
    hb = half if half >= min_rows else full                 # prefer >=2 row blocks per image
    hb = min(hb, full, max_rows)
    return max(align, hb // align * align)


def separable_conv2d_nhwc(x_nhwc, w_dw, w_pw, bn_gamma, bn_beta, bn_mean, bn_var, *,
                          kernel_size=3, stride=1, dilation=1, eps=1e-5,
                          compute_dtype=None, mxu_dtype=None, vmem_limit_bytes=None):
    """NHWC entry point (preferred for stacked blocks).
    x_nhwc: (N, H, W, Cin). w_dw: (Cin, 1, k, k). w_pw: (Cout, Cin, 1, 1)."""
    assert stride == 1, "only stride=1 implemented"  # TODO(synk): strided depthwise conv
    N, H, W, Cin = x_nhwc.shape
    Cout = w_pw.shape[0]
    k = kernel_size
    cdt = jnp.dtype(compute_dtype or x_nhwc.dtype)
    mdt = jnp.dtype(mxu_dtype or cdt)
    out_dt = jnp.dtype(x_nhwc.dtype)

    # getPadded: fixed "same"-style padding (stride 1 -> output H, W unchanged).
    k_eff = k + (k - 1) * (dilation - 1)
    halo = k_eff - 1
    pad_beg = halo // 2
    pad_end = halo - pad_beg
    H_out, W_out = H, W

    # Lane/sublane padding: Cin/Cout -> 128 (dense loads, full MXU K/N), W -> 8 (free reshape,
    # unmasked vst on the output).
    Cin_p = _rup(Cin, _LANE)
    Cout_p = _rup(Cout, _LANE)
    W_out_p = _rup(max(W_out, _SUBLANE), _SUBLANE)
    Wp = W_out_p + halo

    # --- fold eval-mode BatchNorm into the conv weights (host-side, f32 math) ---
    scale = bn_gamma.astype(jnp.float32) / jnp.sqrt(bn_var.astype(jnp.float32) + eps)   # (Cin,)
    bias_bn = bn_beta.astype(jnp.float32) - bn_mean.astype(jnp.float32) * scale         # (Cin,)
    wdw_f = w_dw[:, 0].astype(jnp.float32) * scale[:, None, None]                       # (Cin,k,k)
    wdw_kkc = jnp.transpose(wdw_f, (1, 2, 0)).reshape(k * k, Cin)                       # (k*k,Cin)
    wdw_kkc = jnp.pad(wdw_kkc, ((0, 0), (0, Cin_p - Cin)))                              # f32
    wpw_f = jnp.transpose(w_pw[:, :, 0, 0], (1, 0)).astype(jnp.float32)                 # (Cin,Cout)
    wpw_io = jnp.pad(wpw_f, ((0, Cin_p - Cin), (0, Cout_p - Cout))).astype(mdt)         # (Cin_p,Cout_p)
    bias_out = jnp.pad((bias_bn @ wpw_f)[None, :], ((0, 0), (0, Cout_p - Cout)))        # (1,Cout_p) f32

    # --- generation-aware VMEM budget and row-block size (weights included in footprint) ---
    cap = _vmem_capacity_bytes()
    limit = int(vmem_limit_bytes) if vmem_limit_bytes else min(int(cap * 3 // 4),
                                                               100 * 1024 * 1024)
    tail_rows = max(halo, 1)
    fixed = (2 * k * k * Cin_p * 4                             # depthwise weights, double-buffered
             + 2 * Cin_p * Cout_p * mdt.itemsize               # pointwise weights, double-buffered
             + 2 * Cout_p * 4                                  # bias
             + 2 * tail_rows * Wp * Cin_p * cdt.itemsize)      # halo block, double-buffered
    row_bytes = (2 * Wp * Cin_p * cdt.itemsize                 # body block, double-buffered
                 + 2 * W_out_p * Cout_p * out_dt.itemsize      # output block, double-buffered
                 + Wp * Cin_p * cdt.itemsize                   # in-kernel body+halo concat
                 + W_out_p * Cin_p * 4                         # f32 depthwise accumulator
                 + W_out_p * Cout_p * 4)                       # f32 matmul result
    H_blk = _pick_row_block(H_out, W_out_p, halo, row_bytes, fixed, int(limit * 0.8))
    NB = _cdiv(H_out, H_blk)
    extra_rows = NB * H_blk - H_out

    # --- single padding pass over the activation (no halo-duplicated HBM copy) ---
    x = x_nhwc.astype(cdt)
    x_pad = jnp.pad(x, ((0, 0),
                        (pad_beg, pad_end + extra_rows),
                        (pad_beg, pad_end + (W_out_p - W_out)),
                        (0, Cin_p - Cin)))                     # (N, NB*H_blk + halo, Wp, Cin_p)

    kernel = functools.partial(_sepconv_kernel, H_blk=H_blk, W_out_p=W_out_p,
                               ksize=k, dilation=dilation, halo=halo, mxu_dtype=mdt)

    # Overlapping row windows can't be expressed by a Blocked index_map, so the halo rows are
    # fetched through a SECOND BlockSpec view of the same HBM array (halo-row block at the
    # next block boundary; H_blk is a multiple of halo by construction).  Both grid axes are
    # independent -> "parallel" (megacore sharding on multi-core parts).
    def body_map(n, b):
        return (n, b, 0, 0)

    if halo > 0:
        hb_per_halo = H_blk // halo

        def tail_map(n, b):
            return (n, (b + 1) * hb_per_halo, 0, 0)
    else:
        def tail_map(n, b):
            return (n, 0, 0, 0)

    out = pl.pallas_call(
        kernel,
        out_shape=jax.ShapeDtypeStruct((N, NB, H_blk * W_out_p, Cout_p), out_dt),
        grid=(N, NB),
        in_specs=[
            pl.BlockSpec((1, H_blk, Wp, Cin_p), body_map),
            pl.BlockSpec((1, tail_rows, Wp, Cin_p), tail_map),
            pl.BlockSpec((k * k, Cin_p), lambda n, b: (0, 0)),
            pl.BlockSpec((Cin_p, Cout_p), lambda n, b: (0, 0)),
            pl.BlockSpec((1, Cout_p), lambda n, b: (0, 0)),
        ],
        out_specs=pl.BlockSpec((1, 1, H_blk * W_out_p, Cout_p), lambda n, b: (n, b, 0, 0)),
        compiler_params=pltpu.CompilerParams(
            dimension_semantics=("parallel", "parallel"),
            vmem_limit_bytes=limit),
    )(x_pad, x_pad, wdw_kkc, wpw_io, bias_out)

    # Un-block, crop padded rows / columns / channels.
    out = out.reshape(N, NB * H_blk, W_out_p, Cout_p)[:, :H_out, :W_out, :Cout]
    return out


def separable_conv2d(x_nchw, w_dw, w_pw, bn_gamma, bn_beta, bn_mean, bn_var, **kwargs):
    """PyTorch-shaped NCHW wrapper.  x_nchw: (N, Cin, H, W)."""
    x_nhwc = jnp.transpose(x_nchw, (0, 2, 3, 1))
    y = separable_conv2d_nhwc(x_nhwc, w_dw, w_pw, bn_gamma, bn_beta, bn_mean, bn_var, **kwargs)
    return jnp.transpose(y, (0, 3, 1, 2))


def _reference(x_nchw, w_dw, w_pw, bn_gamma, bn_beta, bn_mean, bn_var,
               *, kernel_size=3, dilation=1, eps=1e-5):
    Cin = x_nchw.shape[1]
    k = kernel_size
    k_eff = k + (k - 1) * (dilation - 1)
    pad_total = k_eff - 1
    pad_beg = pad_total // 2
    pad_end = pad_total - pad_beg
    xp = jnp.pad(x_nchw, ((0, 0), (0, 0), (pad_beg, pad_end), (pad_beg, pad_end)))
    dw = lax.conv_general_dilated(xp, w_dw, (1, 1), 'VALID',
                                  rhs_dilation=(dilation, dilation),
                                  feature_group_count=Cin,
                                  dimension_numbers=('NCHW', 'OIHW', 'NCHW'))
    scale = bn_gamma / jnp.sqrt(bn_var + eps)
    bn = dw * scale[None, :, None, None] + (bn_beta - bn_mean * scale)[None, :, None, None]
    return lax.conv_general_dilated(bn, w_pw, (1, 1), 'VALID',
                                    dimension_numbers=('NCHW', 'OIHW', 'NCHW'))


if __name__ == "__main__":
    key = jax.random.PRNGKey(0)
    k0, k1, k2, k3, k4, k5, k6 = jax.random.split(key, 7)

    N, Cin, Cout, H, W, K = 2, 4, 8, 16, 16, 3

    x = jax.random.normal(k0, (N, Cin, H, W), jnp.float32)
    # deterministic synthetic parameters (PyTorch shapes)
    w_dw = jax.random.normal(k1, (Cin, 1, K, K), jnp.float32) * 0.2      # depthwise
    w_pw = jax.random.normal(k2, (Cout, Cin, 1, 1), jnp.float32) * 0.2   # pointwise
    bn_gamma = 1.0 + 0.1 * jax.random.normal(k3, (Cin,), jnp.float32)
    bn_beta = 0.1 * jax.random.normal(k4, (Cin,), jnp.float32)
    bn_mean = 0.1 * jax.random.normal(k5, (Cin,), jnp.float32)
    bn_var = jnp.abs(jax.random.normal(k6, (Cin,), jnp.float32)) + 0.5

    ref = _reference(x, w_dw, w_pw, bn_gamma, bn_beta, bn_mean, bn_var,
                     kernel_size=K, dilation=1)

    # f32 path (tight check against the XLA reference).
    out = separable_conv2d(x, w_dw, w_pw, bn_gamma, bn_beta, bn_mean, bn_var,
                           kernel_size=K, stride=1, dilation=1)
    out = jax.block_until_ready(out)
    assert out.shape == (N, Cout, H, W), out.shape
    assert jnp.allclose(out, ref, atol=1e-4, rtol=1e-4), float(jnp.max(jnp.abs(out - ref)))

    # bf16 activations: bf16 HBM traffic / MXU operands, f32 depthwise + matmul accumulation.
    out_bf16 = separable_conv2d(x.astype(jnp.bfloat16), w_dw, w_pw,
                                bn_gamma, bn_beta, bn_mean, bn_var,
                                kernel_size=K, stride=1, dilation=1)
    out_bf16 = jax.block_until_ready(out_bf16)
    assert out_bf16.dtype == jnp.bfloat16, out_bf16.dtype
    assert out_bf16.shape == (N, Cout, H, W), out_bf16.shape
    err = float(jnp.max(jnp.abs(out_bf16.astype(jnp.float32) - ref)))
    assert jnp.allclose(out_bf16.astype(jnp.float32), ref, atol=1e-1, rtol=1e-1), err

    # f32 activations with bf16 MXU operands for the pointwise 1x1 conv (review item).
    out_mxu = separable_conv2d(x, w_dw, w_pw, bn_gamma, bn_beta, bn_mean, bn_var,
                               kernel_size=K, stride=1, dilation=1,
                               mxu_dtype=jnp.bfloat16)
    out_mxu = jax.block_until_ready(out_mxu)
    err = float(jnp.max(jnp.abs(out_mxu - ref)))
    assert jnp.allclose(out_mxu, ref, atol=5e-2, rtol=5e-2), err

    # dilation=2 path (ASPP-style atrous depthwise conv).
    ref_d2 = _reference(x, w_dw, w_pw, bn_gamma, bn_beta, bn_mean, bn_var,
                        kernel_size=K, dilation=2)
    out_d2 = separable_conv2d(x, w_dw, w_pw, bn_gamma, bn_beta, bn_mean, bn_var,
                              kernel_size=K, stride=1, dilation=2)
    out_d2 = jax.block_until_ready(out_d2)
    assert out_d2.shape == (N, Cout, H, W), out_d2.shape
    assert jnp.allclose(out_d2, ref_d2, atol=1e-4, rtol=1e-4), \
        float(jnp.max(jnp.abs(out_d2 - ref_d2)))

    print("KERNEL_OK")
</pallas_src>

<mosaic_0001>
module attributes {stable_mosaic.version = 11 : i64} {
  func.func @_sepconv_kernel(%arg0: i32, %arg1: i32, %arg2: memref<1x16x18x128xf32, #tpu.memory_space<vmem>>, %arg3: memref<1x2x18x128xf32, #tpu.memory_space<vmem>>, %arg4: memref<9x128xf32, #tpu.memory_space<vmem>>, %arg5: memref<128x128xf32, #tpu.memory_space<vmem>>, %arg6: memref<1x128xf32, #tpu.memory_space<vmem>>, %arg7: memref<1x1x256x128xf32, #tpu.memory_space<vmem>>) attributes {dimension_semantics = [#tpu.dimension_semantics<parallel>, #tpu.dimension_semantics<parallel>], iteration_bounds = array<i64: 2, 1>, scalar_prefetch = 0 : i64, scratch_operands = 0 : i64, tpu.core_type = #tpu.core_type<tc>, window_params = [{transform_indices = @transform_0, window_bounds = array<i64: 1, 16, 18, 128>}, {transform_indices = @transform_1, window_bounds = array<i64: 1, 2, 18, 128>}, {pipeline_mode = #tpu.pipeline_mode<synchronous>, transform_indices = @transform_2, window_bounds = array<i64: 9, 128>}, {pipeline_mode = #tpu.pipeline_mode<synchronous>, transform_indices = @transform_3, window_bounds = array<i64: 128, 128>}, {pipeline_mode = #tpu.pipeline_mode<synchronous>, transform_indices = @transform_4, window_bounds = array<i64: 1, 128>}, {transform_indices = @transform_5, window_bounds = array<i64: 1, 1, 256, 128>}]} {
    %c0 = arith.constant 0 : index
    %c0_0 = arith.constant 0 : index
    %c0_1 = arith.constant 0 : index
    %c0_2 = arith.constant 0 : index
    %0 = vector.load %arg2[%c0, %c0_0, %c0_1, %c0_2] : memref<1x16x18x128xf32, #tpu.memory_space<vmem>>, vector<1x16x18x128xf32>
    %1 = vector.shape_cast %0 : vector<1x16x18x128xf32> to vector<16x18x128xf32>
    %c0_3 = arith.constant 0 : index
    %c0_4 = arith.constant 0 : index
    %c0_5 = arith.constant 0 : index
    %c0_6 = arith.constant 0 : index
    %2 = vector.load %arg3[%c0_3, %c0_4, %c0_5, %c0_6] : memref<1x2x18x128xf32, #tpu.memory_space<vmem>>, vector<1x2x18x128xf32>
    %3 = vector.shape_cast %2 : vector<1x2x18x128xf32> to vector<2x18x128xf32>
    %4 = tpu.concatenate %1, %3 in 0 : vector<16x18x128xf32>, vector<2x18x128xf32> -> vector<18x18x128xf32>
    %c0_7 = arith.constant 0 : index
    %c0_8 = arith.constant 0 : index
    %5 = vector.load %arg4[%c0_7, %c0_8] : memref<9x128xf32, #tpu.memory_space<vmem>>, vector<9x128xf32>
    %6 = vector.extract_strided_slice %4 {offsets = [0, 0, 0], sizes = [18, 16, 128], strides = [1, 1, 1]} : vector<18x18x128xf32> to vector<18x16x128xf32>
    %7 = vector.extract_strided_slice %6 {offsets = [0, 0, 0], sizes = [16, 16, 128], strides = [1, 1, 1]} : vector<18x16x128xf32> to vector<16x16x128xf32>
    %8 = vector.extract_strided_slice %5 {offsets = [0, 0], sizes = [1, 128], strides = [1, 1]} : vector<9x128xf32> to vector<1x128xf32>
    %9 = vector.shape_cast %8 : vector<1x128xf32> to vector<128xf32>
    %10 = vector.shape_cast %9 : vector<128xf32> to vector<1x1x128xf32>
    %11 = vector.broadcast %10 : vector<1x1x128xf32> to vector<16x16x128xf32>
    %12 = arith.mulf %7, %11 : vector<16x16x128xf32>
    %13 = vector.extract_strided_slice %6 {offsets = [1, 0, 0], sizes = [16, 16, 128], strides = [1, 1, 1]} : vector<18x16x128xf32> to vector<16x16x128xf32>
    %14 = vector.extract_strided_slice %5 {offsets = [3, 0], sizes = [1, 128], strides = [1, 1]} : vector<9x128xf32> to vector<1x128xf32>
    %15 = vector.shape_cast %14 : vector<1x128xf32> to vector<128xf32>
    %16 = vector.shape_cast %15 : vector<128xf32> to vector<1x1x128xf32>
    %17 = vector.broadcast %16 : vector<1x1x128xf32> to vector<16x16x128xf32>
    %18 = arith.mulf %13, %17 : vector<16x16x128xf32>
    %19 = arith.addf %12, %18 : vector<16x16x128xf32>
    %20 = vector.extract_strided_slice %6 {offsets = [2, 0, 0], sizes = [16, 16, 128], strides = [1, 1, 1]} : vector<18x16x128xf32> to vector<16x16x128xf32>
    %21 = vector.extract_strided_slice %5 {offsets = [6, 0], sizes = [1, 128], strides = [1, 1]} : vector<9x128xf32> to vector<1x128xf32>
    %22 = vector.shape_cast %21 : vector<1x128xf32> to vector<128xf32>
    %23 = vector.shape_cast %22 : vector<128xf32> to vector<1x1x128xf32>
    %24 = vector.broadcast %23 : vector<1x1x128xf32> to vector<16x16x128xf32>
    %25 = arith.mulf %20, %24 : vector<16x16x128xf32>
    %26 = arith.addf %19, %25 : vector<16x16x128xf32>
    %27 = vector.extract_strided_slice %4 {offsets = [0, 1, 0], sizes = [18, 16, 128], strides = [1, 1, 1]} : vector<18x18x128xf32> to vector<18x16x128xf32>
    %28 = vector.extract_strided_slice %27 {offsets = [0, 0, 0], sizes = [16, 16, 128], strides = [1, 1, 1]} : vector<18x16x128xf32> to vector<16x16x128xf32>
    %29 = vector.extract_strided_slice %5 {offsets = [1, 0], sizes = [1, 128], strides = [1, 1]} : vector<9x128xf32> to vector<1x128xf32>
    %30 = vector.shape_cast %29 : vector<1x128xf32> to vector<128xf32>
    %31 = vector.shape_cast %30 : vector<128xf32> to vector<1x1x128xf32>
    %32 = vector.broadcast %31 : vector<1x1x128xf32> to vector<16x16x128xf32>
    %33 = arith.mulf %28, %32 : vector<16x16x128xf32>
    %34 = arith.addf %26, %33 : vector<16x16x128xf32>
    %35 = vector.extract_strided_slice %27 {offsets = [1, 0, 0], sizes = [16, 16, 128], strides = [1, 1, 1]} : vector<18x16x128xf32> to vector<16x16x128xf32>
    %36 = vector.extract_strided_slice %5 {offsets = [4, 0], sizes = [1, 128], strides = [1, 1]} : vector<9x128xf32> to vector<1x128xf32>
    %37 = vector.shape_cast %36 : vector<1x128xf32> to vector<128xf32>
    %38 = vector.shape_cast %37 : vector<128xf32> to vector<1x1x128xf32>
    %39 = vector.broadcast %38 : vector<1x1x128xf32> to vector<16x16x128xf32>
    %40 = arith.mulf %35, %39 : vector<16x16x128xf32>
    %41 = arith.addf %34, %40 : vector<16x16x128xf32>
    %42 = vector.extract_strided_slice %27 {offsets = [2, 0, 0], sizes = [16, 16, 128], strides = [1, 1, 1]} : vector<18x16x128xf32> to vector<16x16x128xf32>
    %43 = vector.extract_strided_slice %5 {offsets = [7, 0], sizes = [1, 128], strides = [1, 1]} : vector<9x128xf32> to vector<1x128xf32>
    %44 = vector.shape_cast %43 : vector<1x128xf32> to vector<128xf32>
    %45 = vector.shape_cast %44 : vector<128xf32> to vector<1x1x128xf32>
    %46 = vector.broadcast %45 : vector<1x1x128xf32> to vector<16x16x128xf32>
    %47 = arith.mulf %42, %46 : vector<16x16x128xf32>
    %48 = arith.addf %41, %47 : vector<16x16x128xf32>
    %49 = vector.extract_strided_slice %4 {offsets = [0, 2, 0], sizes = [18, 16, 128], strides = [1, 1, 1]} : vector<18x18x128xf32> to vector<18x16x128xf32>
    %50 = vector.extract_strided_slice %49 {offsets = [0, 0, 0], sizes = [16, 16, 128], strides = [1, 1, 1]} : vector<18x16x128xf32> to vector<16x16x128xf32>
    %51 = vector.extract_strided_slice %5 {offsets = [2, 0], sizes = [1, 128], strides = [1, 1]} : vector<9x128xf32> to vector<1x128xf32>
    %52 = vector.shape_cast %51 : vector<1x128xf32> to vector<128xf32>
    %53 = vector.shape_cast %52 : vector<128xf32> to vector<1x1x128xf32>
    %54 = vector.broadcast %53 : vector<1x1x128xf32> to vector<16x16x128xf32>
    %55 = arith.mulf %50, %54 : vector<16x16x128xf32>
    %56 = arith.addf %48, %55 : vector<16x16x128xf32>
    %57 = vector.extract_strided_slice %49 {offsets = [1, 0, 0], sizes = [16, 16, 128], strides = [1, 1, 1]} : vector<18x16x128xf32> to vector<16x16x128xf32>
    %58 = vector.extract_strided_slice %5 {offsets = [5, 0], sizes = [1, 128], strides = [1, 1]} : vector<9x128xf32> to vector<1x128xf32>
    %59 = vector.shape_cast %58 : vector<1x128xf32> to vector<128xf32>
    %60 = vector.shape_cast %59 : vector<128xf32> to vector<1x1x128xf32>
    %61 = vector.broadcast %60 : vector<1x1x128xf32> to vector<16x16x128xf32>
    %62 = arith.mulf %57, %61 : vector<16x16x128xf32>
    %63 = arith.addf %56, %62 : vector<16x16x128xf32>
    %64 = vector.extract_strided_slice %49 {offsets = [2, 0, 0], sizes = [16, 16, 128], strides = [1, 1, 1]} : vector<18x16x128xf32> to vector<16x16x128xf32>
    %65 = vector.extract_strided_slice %5 {offsets = [8, 0], sizes = [1, 128], strides = [1, 1]} : vector<9x128xf32> to vector<1x128xf32>
    %66 = vector.shape_cast %65 : vector<1x128xf32> to vector<128xf32>
    %67 = vector.shape_cast %66 : vector<128xf32> to vector<1x1x128xf32>
    %68 = vector.broadcast %67 : vector<1x1x128xf32> to vector<16x16x128xf32>
    %69 = arith.mulf %64, %68 : vector<16x16x128xf32>
    %70 = arith.addf %63, %69 : vector<16x16x128xf32>
    %71 = vector.shape_cast %70 : vector<16x16x128xf32> to vector<256x128xf32>
    %c0_9 = arith.constant 0 : index
    %c0_10 = arith.constant 0 : index
    %72 = vector.load %arg5[%c0_9, %c0_10] : memref<128x128xf32, #tpu.memory_space<vmem>>, vector<128x128xf32>
    %cst = arith.constant dense<0.000000e+00> : vector<256x128xf32>
    %73 = tpu.matmul %71, %72, %cst {dimension_numbers = #tpu.dot_dimension_numbers<[1], [0], [0], [1], [0, 0, 1, 1], [], []>} : vector<256x128xf32>, vector<128x128xf32>, vector<256x128xf32> -> vector<256x128xf32>
    %c0_11 = arith.constant 0 : index
    %c0_12 = arith.constant 0 : index
    %74 = vector.load %arg6[%c0_11, %c0_12] : memref<1x128xf32, #tpu.memory_space<vmem>>, vector<1x128xf32>
    %75 = vector.shape_cast %74 : vector<1x128xf32> to vector<128xf32>
    %76 = vector.shape_cast %75 : vector<128xf32> to vector<1x128xf32>
    %77 = vector.broadcast %76 : vector<1x128xf32> to vector<256x128xf32>
    %78 = arith.addf %73, %77 : vector<256x128xf32>
    %c0_13 = arith.constant 0 : index
    %c0_14 = arith.constant 0 : index
    %c0_15 = arith.constant 0 : index
    %c0_16 = arith.constant 0 : index
    %79 = vector.load %arg7[%c0_13, %c0_14, %c0_15, %c0_16] : memref<1x1x256x128xf32, #tpu.memory_space<vmem>>, vector<1x1x256x128xf32>
    %80 = vector.shape_cast %79 : vector<1x1x256x128xf32> to vector<256x128xf32>
    %81 = vector.shape_cast %78 : vector<256x128xf32> to vector<1x1x256x128xf32>
    tpu.vector_store %arg7[%c0_13, %c0_14, %c0_15, %c0_16], %81 {strides = array<i32>} : memref<1x1x256x128xf32, #tpu.memory_space<vmem>>, vector<1x1x256x128xf32>,
    return
  }
  func.func @transform_0(%arg0: i32, %arg1: i32) -> (i32, i32, i32, i32) {
    %c0_i32 = arith.constant 0 : i32
    %c0_i32_0 = arith.constant 0 : i32
    %c0_i32_1 = arith.constant 0 : i32
    return %arg0, %arg1, %c0_i32, %c0_i32_0 : i32, i32, i32, i32
  }
  func.func @transform_1(%arg0: i32, %arg1: i32) -> (i32, i32, i32, i32) {
    %c1_i32 = arith.constant 1 : i32
    %0 = arith.addi %arg1, %c1_i32 : i32
    %c8_i32 = arith.constant 8 : i32
    %1 = arith.muli %0, %c8_i32 : i32
    %c0_i32 = arith.constant 0 : i32
    %c0_i32_0 = arith.constant 0 : i32
    %c0_i32_1 = arith.constant 0 : i32
    return %arg0, %1, %c0_i32, %c0_i32_0 : i32, i32, i32, i32
  }
  func.func @transform_2(%arg0: i32, %arg1: i32) -> (i32, i32) {
    %c0_i32 = arith.constant 0 : i32
    %c0_i32_0 = arith.constant 0 : i32
    %c0_i32_1 = arith.constant 0 : i32
    return %c0_i32, %c0_i32_0 : i32, i32
  }
  func.func @transform_3(%arg0: i32, %arg1: i32) -> (i32, i32) {
    %c0_i32 = arith.constant 0 : i32
    %c0_i32_0 = arith.constant 0 : i32
    %c0_i32_1 = arith.constant 0 : i32
    return %c0_i32, %c0_i32_0 : i32, i32
  }
  func.func @transform_4(%arg0: i32, %arg1: i32) -> (i32, i32) {
    %c0_i32 = arith.constant 0 : i32
    %c0_i32_0 = arith.constant 0 : i32
    %c0_i32_1 = arith.constant 0 : i32
    return %c0_i32, %c0_i32_0 : i32, i32
  }
  func.func @transform_5(%arg0: i32, %arg1: i32) -> (i32, i32, i32, i32) {
    %c0_i32 = arith.constant 0 : i32
    %c0_i32_0 = arith.constant 0 : i32
    %c0_i32_1 = arith.constant 0 : i32
    return %arg0, %arg1, %c0_i32, %c0_i32_0 : i32, i32, i32, i32
  }
}

</mosaic_0001>

<bundles_post_ra>
// kernel: tpu_custom_call.1
= control target key start
LH: loop header
LB: loop body
LE: loop exit
PB: predicated region body
PF: predicated region fallthrough
CT: control target
= control target key end

     0   :  { %10 = vsyncpa [#allocation3], 0  ;;  %s4872_s0 = inlined_call_operand.vmem [shape: f32[2,18,18,128], index: 0, kind: input, shape index: {}]   ;;  %s4873_s1 = inlined_call_operand.vmem [shape: f32[2,18,18,128], index: 1, kind: input, shape index: {}]   ;;  %s4874_s2 = inlined_call_operand.vmem [shape: f32[9,128], index: 2, kind: input, shape index: {}]   ;;  %s4875_s3 = inlined_call_operand.vmem [shape: f32[128,128], index: 3, kind: input, shape index: {}]   ;;  %s4876_s4 = inlined_call_operand.vmem [shape: f32[1,128], index: 4, kind: input, shape index: {}]   ;;  %s4877_s5 = inlined_call_operand.hbm [shape: f32[2,1,256,128], index: 5, kind: output, shape index: {}]  }
   0x1   :  { %12 = vsyncpa [#allocation3 + $0x1], 0  ;;  %s2802_s18 = smov 0   ;;  %s2804_s19 = smov 0  }
   0x2   :  { %s2806_s20 = smov 0   ;;  %s2808_s21 = smov 0  }
   0x3   :  { %s2810_s22 = smov 0   ;;  %s2812_s23 = smov 0  }
   0x4 LB: > { %s2427_s24 = sadd.s32 4294967295, %s2767_s23   ;;  %s2428_s25 = sadd.s32 4294967294, %s2767_s23   ;;  %s2767_s23 = sphi %s2812_s23, %s18_s23   ;;  %s2763_s22 = sphi %s2810_s22, %s4908_s22   ;;  %s2759_s21 = sphi %s2808_s21, %s4907_s21   ;;  %s2755_s20 = sphi %s2806_s20, %s4906_s20   ;;  %s2751_s19 = sphi %s2804_s19, %s4905_s19   ;;  %s2747_s18 = sphi %s2802_s18, %s4904_s18  }
   0x5   : > { %s30_s26 = sadd.s32 1, %s2763_s22  ;;  %s162_s27 = sadd.s32 1, %s2755_s20 }
   0x6   : > { %p32_p0 = scmp.ge.s32.totalorder %s30_s26, 2  ;;  %p172_p1 = scmp.ne.s32.totalorder %s2755_s20, %s2751_s19 }
   0x7   : > { %p173_p2 = scmp.eq.s32.totalorder %s2427_s24, 1  ;;  %p178_p3 = scmp.ne.s32.totalorder %s2751_s19, %s2747_s18 }
   0x8   : > { %s4910_s26 = smov (%p32_p0, %s30_s26), 0  ;;  %p179_p5 = scmp.eq.s32.totalorder %s2428_s25, 1 }
   0x9   : > { %p2842_p4 = por %p173_p2, %p172_p1  ;;  %s157_s29 = ssub.s32 %s2763_s22, %s4910_s26 }
   0xa   : > { %p2431_p6 = scmp.ge.s32.totalorder %s2767_s23, 1  ;;  %p160_p7 = scmp.eq.s32.totalorder %s157_s29, 0 }
   0xb   : > { %p2849_p8 = por %p179_p5, %p178_p3  ;;  %p248_p9 = scmp.lt.s32.totalorder %s2767_s23, 3 }
   0xc   : > { %s2855_s6 = scalar_select %p160_p7, %s2755_s20, %s162_s27  }
   0xd   : > { %p249_p10 = pnand %p2431_p6, %p248_p9 }
   0xe   : > { %v2028_v0 = vld [vmem:[%s4875_s3] sm:$0xff] (!%p249_p10)  ;;  %v2029_v1 = vld [vmem:[%s4875_s3 + $0x8] sm:$0xff] (!%p249_p10)  ;;  %v2030_v2 = vld [vmem:[%s4875_s3 + $0x10] sm:$0xff] (!%p249_p10)  ;;  %p304_p11 = scmp.lt.s32.totalorder (!%p249_p10), %s2759_s21, 1  ;;  %v390_v3 = vlaneseq (!%p249_p10)  ;;  %vm662_vm0 = vcmask (!%p249_p10), 1046528   ;;  %vm1395_vm1 = vcmask (!%p249_p10), 1045504  }
   0xf   : > { %252 = sbr.rel (%p249_p10) target bundleno = 550 (0x226), region = 40  ;;  %v2573_v4 = vpack.c.bf16 (!%p249_p10), %v2029_v1, %v2028_v0  ;;  %v2031_v5 = vld [vmem:[%s4875_s3 + $0x18] sm:$0xff] (!%p249_p10)  ;;  %v2032_v6 = vld [vmem:[%s4875_s3 + $0x20] sm:$0xff] (!%p249_p10)  ;;  %v2033_v7 = vld [vmem:[%s4875_s3 + $0x28] sm:$0xff] (!%p249_p10)  ;;  %s295_s12 = sand.u32 (!%p249_p10), 1, %s2751_s19  }
  0x10   : > { %v2577_v8 = vpack.c.bf16 (!%p249_p10), %v2031_v5, %v2030_v2  ;;  %v2034_v9 = vld [vmem:[%s4875_s3 + $0x30] sm:$0xff] (!%p249_p10)  ;;  %v2035_v10 = vld [vmem:[%s4875_s3 + $0x38] sm:$0xff] (!%p249_p10)  ;;  %v2036_v11 = vld [vmem:[%s4875_s3 + $0x40] sm:$0xff] (!%p249_p10)  ;;  %v391_v12 = vshrl.u32 (!%p249_p10), %v390_v3, 7  ;;  %v2581_v16 = vpack.c.bf16 (!%p249_p10), %v2033_v7, %v2032_v6  ;;  %s2432_s13 = sshll.u32 (!%p249_p10), %s295_s12, 8  ;;  %s2444_s17 = sshll.u32 (!%p249_p10), %s2759_s21, 12 }
  0x11   : > { %2574 = vmatprep.subr.bf16.mxu0 (!%p249_p10), %v2573_v4  ;;  %2605 = vmatprep.subr.bf16.mxu1 (!%p249_p10), %v2573_v4  ;;  %v2037_v13 = vld [vmem:[%s4875_s3 + $0x48] sm:$0xff] (!%p249_p10)  ;;  %v2038_v14 = vld [vmem:[%s4875_s3 + $0x50] sm:$0xff] (!%p249_p10)  ;;  %v2039_v15 = vld [vmem:[%s4875_s3 + $0x58] sm:$0xff] (!%p249_p10)  ;;  %v2897_v17 = vpack.c.bf16 (!%p249_p10), %v2035_v10, %v2034_v9  ;;  %s2769_s7 = smov (!%p249_p10), [#allocation2]  }
  0x12   : > { %2576 = vmatpush3.bf16.msra.mxu0 (!%p249_p10), %v2573_v4  ;;  %2613 = vmatpush3.bf16.msra.mxu1 (!%p249_p10), %v2573_v4  ;;  %v2040_v18 = vld [vmem:[%s4875_s3 + $0x60] sm:$0xff] (!%p249_p10)  ;;  %v2041_v19 = vld [vmem:[%s4875_s3 + $0x68] sm:$0xff] (!%p249_p10)  ;;  %v2042_v20 = vld [vmem:[%s4875_s3 + $0x70] sm:$0xff] (!%p249_p10)  ;;  %v392_v21 = vsub.s32 (!%p249_p10), 0, %v391_v12  ;;  %v428_v22 = vsub.s32 (!%p249_p10), 3, %v391_v12  ;;  %v2909_v23 = vpack.c.bf16 (!%p249_p10), %v2037_v13, %v2036_v11  ;;  %v2911_v24 = vpack.c.bf16 (!%p249_p10), %v2039_v15, %v2038_v14 }
  0x13   : > { %2578 = vmatprep.subr.bf16.mxu0 (!%p249_p10), %v2577_v8  ;;  %2606 = vmatprep.subr.bf16.mxu1 (!%p249_p10), %v2577_v8  ;;  %v2913_v25 = vpack.c.bf16 (!%p249_p10), %v2041_v19, %v2040_v18  ;;  %v2043_v26 = vld [vmem:[%s4875_s3 + $0x78] sm:$0xff] (!%p249_p10)  ;;  %v388_v27 = vld [vmem:[%s4874_s2] sm:$0xff] (!%p249_p10)  ;;  %v496_v28 = vsub.s32 (!%p249_p10), 6, %v391_v12  ;;  %v564_v32 = vsub.s32 (!%p249_p10), 1, %v391_v12  ;;  %v809_v37 = vsub.s32 (!%p249_p10), 4, %v391_v12 }
  0x14   : > { %v2921_v29 = vpack.c.bf16 (!%p249_p10), %v2043_v26, %v2042_v20  ;;  %v2930_v30 = vrot.slane (!%p249_p10), %v388_v27, %v392_v21  ;;  %v2932_v31 = vrot.slane (!%p249_p10), %v388_v27, %v428_v22  ;;  %v1053_v38 = vsub.s32 (!%p249_p10), 7, %v391_v12  ;;  %v2992_v1 = vld [vmem:[%s4874_s2 + $0x8] ss:$0 sm:$0xff] (!%p249_p10) }
  0x15   : > { %v2939_v36 = vrot.slane (!%p249_p10), %v388_v27, %v496_v28  ;;  %v1297_v39 = vsub.s32 (!%p249_p10), 2, %v391_v12  ;;  %v1542_v45 = vsub.s32 (!%p249_p10), 5, %v391_v12  ;;  %v2955_v48 = vrot.slane (!%p249_p10), %v388_v27, %v564_v32 }
  0x16   : > { %s2886_s10 = scalar_select %p304_p11, %s2759_s21, 1  ;;  %2580 = vmatpush3.bf16.msra.mxu0 %v2577_v8  ;;  %2614 = vmatpush3.bf16.msra.mxu1 %v2577_v8  ;;  %v2957_v50 = vrot.slane %v388_v27, %v809_v37  ;;  %v2959_v51 = vrot.slane %v388_v27, %v1053_v38 }
  0x17   : > { %2582 = vmatprep.subr.bf16.mxu0 %v2581_v16  ;;  %2607 = vmatprep.subr.bf16.mxu1 %v2581_v16  ;;  %v2961_v52 = vrot.slane %v388_v27, %v1297_v39  ;;  %v2969_v56 = vrot.slane %v388_v27, %v1542_v45  ;;  %s4826_s21 = scalar_lea.sflag [#allocation3], %s295_s12 }
  0x18   : > { %s2621_s8 = smul.u32 432, %s2886_s10 }
  0x1a   : > { %s2928_s16 = scalar_lea.vmem %s4872_s0, %s2621_s8  ;;  %2584 = vmatpush3.bf16.msra.mxu0 %v2581_v16  ;;  %2615 = vmatpush3.bf16.msra.mxu1 %v2581_v16  ;;  %s2443_s29 = sadd.s32 384, %s2621_s8 }
  0x1b   : > { %v334_v33 = vld [vmem:[%s2928_s16] sm:$0xff]  ;;  %v335_v34 = vld [vmem:[%s2928_s16 + $0x8] sm:$0xff]  ;;  %v2937_v35 = vld [vmem:[%s2928_s16 + $0x18] sm:$0xff]  ;;  %2586 = vmatprep.subr.bf16.mxu0 %v2897_v17  ;;  %2608 = vmatprep.subr.bf16.mxu1 %v2897_v17  ;;  %s4347_s8 = scalar_lea.vmem %s4873_s1, %s2443_s29  ;;  %s4817_s29 = scalar_lea.hbm %s4877_s5, %s2444_s17 }
  0x1c   : > { %v2942_v40 = vld [vmem:[%s2928_s16 + $0x20] sm:$0xff]  ;;  %v2945_v41 = vld [vmem:[%s2928_s16 + $0x30] sm:$0xff]  ;;  %v394_v42 = vmul.f32 %v2930_v30, %v334_v33  ;;  %v395_v43 = vmul.f32 %v2930_v30, %v335_v34  ;;  %v430_v44 = vmul.f32 %v2932_v31, %v2937_v35  ;;  %v566_v54 = vmul.f32 %v2955_v48, %v334_v33  ;;  %v2972_v57 = vld [vmem:[%s2928_s16 + $0x38] sm:$0xff] }
  0x1d   : > { %v431_v46 = vmul.f32 %v2932_v31, %v2942_v40  ;;  %v498_v47 = vmul.f32 %v2939_v36, %v2945_v41  ;;  %v2967_v55 = vmul.f32 %v2955_v48, %v335_v34  ;;  %v811_v59 = vmul.f32 %v2957_v50, %v2937_v35  ;;  %v358_v10 = vld [vmem:[%s2928_s16 + $0xc0] sm:$0xff]  ;;  %v3013_v15 = vld [vmem:[%s2928_s16 + $0xd8] sm:$0xff]  ;;  %v3016_v16 = vld [vmem:[%s2928_s16 + $0xf0] sm:$0xff] }
  0x1e   : > { %v462_v49 = vadd.f32 %v430_v44, %v394_v42  ;;  %v2978_v60 = vmul.f32 %v2957_v50, %v2942_v40  ;;  %v663_v61 = vrot.slane %v566_v54, 1  ;;  %v1055_v63 = vmul.f32 %v2959_v51, %v2945_v41  ;;  %2588 = vmatpush3.bf16.msra.mxu0 %v2897_v17  ;;  %2616 = vmatpush3.bf16.msra.mxu1 %v2897_v17  ;;  %v3030_v21 = vld [vmem:[%s2928_s16 + $0xc8] sm:$0xff] }
  0x1f   : > { %v2963_v53 = vadd.f32 %v431_v46, %v395_v43  ;;  %v664_v62 = vrot.slane %v2967_v55, 1  ;;  %v2987_v0 = vmul.f32 %v2959_v51, %v2972_v57  ;;  %v907_v2 = vrot.slane %v811_v59, 1  ;;  %2590 = vmatprep.subr.bf16.mxu0 %v2909_v23  ;;  %2609 = vmatprep.subr.bf16.mxu1 %v2909_v23  ;;  %v3068_v59 = vld [vmem:[%s2928_s16 + $0xf8] sm:$0xff] }
  0x20   : > { %v530_v58 = vadd.f32 %v498_v47, %v462_v49  ;;  %v908_v3 = vrot.slane %v2978_v60, 1  ;;  %v1299_v4 = vmul.f32 %v2961_v52, %v334_v33  ;;  %v2997_v5 = vmul.f32 %v2961_v52, %v335_v34  ;;  %v3064_v49 = vld [vmem:[%s2928_s16 + $0xe0] sm:$0xff] }
  0x21   : > { %v665_v6 = vsel %vm662_vm0, %v663_v61, %v664_v62  ;;  %v1151_v7 = vrot.slane %v1055_v63, 1  ;;  %v1152_v8 = vrot.slane %v2987_v0, 1  ;;  %v1544_v9 = vmul.f32 %v2969_v56, %v2937_v35 }
  0x22   : > { %v775_v11 = vadd.f32 %v665_v6, %v530_v58  ;;  %v909_v12 = vsel %vm662_vm0, %v907_v2, %v908_v3  ;;  %v1396_v13 = vrot.slane %v1299_v4, 2  ;;  %v1397_v14 = vrot.slane %v2997_v5, 2  ;;  %2592 = vmatpush3.bf16.msra.mxu0 %v2909_v23  ;;  %2617 = vmatpush3.bf16.msra.mxu1 %v2909_v23 }
  0x23   : > { %v1153_v17 = vsel %vm662_vm0, %v1151_v7, %v1152_v8  ;;  %v3025_v18 = vmul.f32 %v2969_v56, %v2942_v40  ;;  %v1640_v19 = vrot.slane %v1544_v9, 2  ;;  %v1788_v20 = vmul.f32 %v2992_v1, %v2945_v41  ;;  %2594 = vmatprep.subr.bf16.mxu0 %v2911_v24  ;;  %2610 = vmatprep.subr.bf16.mxu1 %v2911_v24 }
  0x24   : > { %v1019_v22 = vadd.f32 %v909_v12, %v775_v11  ;;  %v1398_v26 = vsel %vm1395_vm1, %v1396_v13, %v1397_v14  ;;  %v3037_v27 = vmul.f32 %v2992_v1, %v2972_v57  ;;  %v410_v28 = vmul.f32 %v2930_v30, %v358_v10 }
  0x25   : > { %v1641_v32 = vrot.slane %v3025_v18, 2  ;;  %v1884_v33 = vrot.slane %v1788_v20, 2  ;;  %v446_v34 = vmul.f32 %v2932_v31, %v3013_v15  ;;  %v514_v37 = vmul.f32 %v2939_v36, %v3016_v16 }
  0x26   : > { %v1263_v38 = vadd.f32 %v1153_v17, %v1019_v22  ;;  %v1885_v39 = vrot.slane %v3037_v27, 2  ;;  %v590_v42 = vmul.f32 %v2955_v48, %v358_v10  ;;  %v3051_v43 = vmul.f32 %v2955_v48, %v3030_v21  ;;  %2596 = vmatpush3.bf16.msra.mxu0 %v2911_v24  ;;  %2618 = vmatpush3.bf16.msra.mxu1 %v2911_v24 }
  0x27   : > { %v1642_v44 = vsel %vm1395_vm1, %v1640_v19, %v1641_v32  ;;  %v478_v45 = vadd.f32 %v446_v34, %v410_v28  ;;  %v835_v23 = vmul.f32 %v2957_v50, %v3013_v15  ;;  %v3072_v63 = vmul.f32 %v2957_v50, %v3064_v49  ;;  %2598 = vmatprep.subr.bf16.mxu0 %v2913_v25  ;;  %v336_v34 = vld [vmem:[%s2928_s16 + $0x10] sm:$0x3] }
  0x28   : > { %v1508_v46 = vadd.f32 %v1398_v26, %v1263_v38  ;;  %v1886_v47 = vsel %vm1395_vm1, %v1884_v33, %v1885_v39  ;;  %v703_v54 = vrot.slane %v590_v42, 1  ;;  %v704_v58 = vrot.slane %v3051_v43, 1  ;;  %2611 = vmatprep.subr.bf16.mxu1 %v2913_v25 }
  0x29   : > { %v546_v61 = vadd.f32 %v514_v37, %v478_v45  ;;  %v947_v2 = vrot.slane %v835_v23, 1  ;;  %v1079_v4 = vmul.f32 %v2959_v51, %v3016_v16  ;;  %v3083_v9 = vmul.f32 %v2959_v51, %v3068_v59  ;;  %v3107_v37 = vld [vmem:[%s2928_s16 + $0x28] sm:$0x3]  ;;  %v3116_v23 = vld [vmem:[%s2928_s16 + $0x40] sm:$0x3] }
  0x2a   : > { %v1752_v6 = vadd.f32 %v1642_v44, %v1508_v46  ;;  %v705_v7 = vsel %vm662_vm0, %v703_v54, %v704_v58  ;;  %v948_v12 = vrot.slane %v3072_v63, 1  ;;  %v1323_v24 = vmul.f32 %v2961_v52, %v358_v10  ;;  %2600 = vmatpush3.bf16.msra.mxu0 %v2913_v25  ;;  %2619 = vmatpush3.bf16.msra.mxu1 %v2913_v25 }
  0x2b   : > { %v791_v11 = vadd.f32 %v705_v7, %v546_v61  ;;  %v1191_v13 = vrot.slane %v1079_v4, 1  ;;  %v1192_v19 = vrot.slane %v3083_v9, 1  ;;  %v3092_v20 = vmul.f32 %v2961_v52, %v3030_v21  ;;  %2602 = vmatprep.subr.bf16.mxu0 %v2921_v29  ;;  %2612 = vmatprep.subr.bf16.mxu1 %v2921_v29 }
  0x2c   : > { %v1996_v17 = vadd.f32 %v1886_v47, %v1752_v6  ;;  %v1568_v22 = vmul.f32 %v2969_v56, %v3013_v15  ;;  %v949_v26 = vsel %vm662_vm0, %v947_v2, %v948_v12  ;;  %v1436_v28 = vrot.slane %v1323_v24, 2 }
  0x2d   : > { %v3101_v33 = vmul.f32 %v2969_v56, %v3064_v49  ;;  %v1812_v10 = vmul.f32 %v2992_v1, %v3016_v16  ;;  %v1035_v38 = vadd.f32 %v949_v26, %v791_v11  ;;  %v1193_v42 = vsel %vm662_vm0, %v1191_v13, %v1192_v19 }
  0x2e   : > { %v1437_v44 = vrot.slane %v3092_v20, 2  ;;  %v1680_v45 = vrot.slane %v1568_v22, 2  ;;  %v3123_v47 = vmul.f32 %v2992_v1, %v3068_v59  ;;  %v499_v54 = vmul.f32 %v2939_v36, %v2972_v57  ;;  %2525 = vmatprep.mubr.f32.mxu0 %v1996_v17  ;;  %2604 = vmatpush3.bf16.msra.mxu0 %v2921_v29 }
  0x2f   : > { %v1681_v46 = vrot.slane %v3101_v33, 2  ;;  %v1924_v25 = vrot.slane %v1812_v10, 2  ;;  %v1279_v61 = vadd.f32 %v1193_v42, %v1035_v38  ;;  %v568_v4 = vmul.f32 %v2955_v48, %v336_v34  ;;  %2620 = vmatpush3.bf16.msra.mxu1 %v2921_v29 }
  0x30   : > { %v1438_v2 = vsel %vm1395_vm1, %v1436_v28, %v1437_v44  ;;  %v813_v6 = vmul.f32 %v2957_v50, %v3107_v37  ;;  %v1925_v11 = vrot.slane %v3123_v47, 2  ;;  %v531_v13 = vadd.f32 %v499_v54, %v2963_v53 }
  0x31   : > { %v1682_v7 = vsel %vm1395_vm1, %v1680_v45, %v1681_v46  ;;  %v1057_v24 = vmul.f32 %v2959_v51, %v3116_v23  ;;  %v1524_v17 = vadd.f32 %v1438_v2, %v1279_v61  ;;  %v666_v22 = vrot.slane %v568_v4, 1 }
  0x32   : > { %v910_v26 = vrot.slane %v813_v6, 1  ;;  %v1301_v28 = vmul.f32 %v2961_v52, %v336_v34  ;;  %v1926_v10 = vsel %vm1395_vm1, %v1924_v25, %v1925_v11  ;;  %v1546_v53 = vmul.f32 %v2969_v56, %v3107_v37  ;;  %v360_v34 = vld [vmem:[%s2928_s16 + $0xd0] sm:$0x3]  ;;  %v3159_v6 = vld [vmem:[%s2928_s16 + $0xe8] sm:$0x3] }
  0x33   : > { %v1154_v38 = vrot.slane %v1057_v24, 1  ;;  %v1790_v42 = vmul.f32 %v2992_v1, %v3116_v23  ;;  %v1768_v45 = vadd.f32 %v1682_v7, %v1524_v17  ;;  %v667_v29 = vsel %vm662_vm0, %v664_v62, %v666_v22  ;;  %v3162_v7 = vld [vmem:[%s2928_s16 + $0x100] sm:$0x3] }
  0x34   : > { %v911_v47 = vsel %vm662_vm0, %v908_v3, %v910_v26  ;;  %v1399_v54 = vrot.slane %v1301_v28, 2  ;;  %v776_v61 = vadd.f32 %v667_v29, %v531_v13  ;;  %v1643_v2 = vrot.slane %v1546_v53, 2  ;;  %v3190_v29 = vld [vmem:[%s2928_s16 + $0x48] sm:$0xff] }
  0x35   : > { %v1155_v25 = vsel %vm662_vm0, %v1152_v8, %v1154_v38  ;;  %v1887_v4 = vrot.slane %v1790_v42, 2  ;;  %v2012_v55 = vadd.f32 %v1926_v10, %v1768_v45  ;;  %v411_v62 = vmul.f32 %v2930_v30, %v3030_v21 }
  0x36   : > { %v1400_v60 = vsel %vm1395_vm1, %v1397_v14, %v1399_v54  ;;  %v447_v3 = vmul.f32 %v2932_v31, %v3064_v49  ;;  %v1020_v0 = vadd.f32 %v911_v47, %v776_v61  ;;  %v1644_v8 = vsel %vm1395_vm1, %v1641_v32, %v1643_v2 }
  0x37   : > { %v1888_v13 = vsel %vm1395_vm1, %v1885_v39, %v1887_v4  ;;  %v515_v5 = vmul.f32 %v2939_v36, %v3068_v59  ;;  %2549 = vmatprep.mubr.f32.mxu1 %v2012_v55  ;;  %v592_v21 = vmul.f32 %v2955_v48, %v360_v34  ;;  %v837_v24 = vmul.f32 %v2957_v50, %v3159_v6 }
  0x38   : > { %v479_v14 = vadd.f32 %v447_v3, %v411_v62  ;;  %v1081_v18 = vmul.f32 %v2959_v51, %v3162_v7  ;;  %v1264_v17 = vadd.f32 %v1155_v25, %v1020_v0  ;;  %v1325_v32 = vmul.f32 %v2961_v52, %v360_v34 }
  0x39   : > { %v1570_v27 = vmul.f32 %v2969_v56, %v3159_v6  ;;  %v1814_v39 = vmul.f32 %v2992_v1, %v3162_v7  ;;  %v706_v26 = vrot.slane %v592_v21, 1  ;;  %v950_v28 = vrot.slane %v837_v24, 1 }
  0x3a   : > { %v547_v22 = vadd.f32 %v515_v5, %v479_v14  ;;  %v1194_v10 = vrot.slane %v1081_v18, 1  ;;  %v1509_v38 = vadd.f32 %v1400_v60, %v1264_v17  ;;  %v1439_v53 = vrot.slane %v1325_v32, 2 }
  0x3b   : > { %v1683_v42 = vrot.slane %v1570_v27, 2  ;;  %v1927_v45 = vrot.slane %v1814_v39, 2  ;;  %v707_v47 = vsel %vm662_vm0, %v704_v58, %v706_v26  ;;  %v951_v54 = vsel %vm662_vm0, %v948_v12, %v950_v28 }
  0x3c   : > { %v1195_v34 = vsel %vm662_vm0, %v1192_v19, %v1194_v10  ;;  %v396_v61 = vmul.f32 %v2930_v30, %v2937_v35  ;;  %v1753_v25 = vadd.f32 %v1644_v8, %v1509_v38  ;;  %v792_v2 = vadd.f32 %v707_v47, %v547_v22 }
  0x3d   : > { %v1440_v43 = vsel %vm1395_vm1, %v1437_v44, %v1439_v53  ;;  %v1684_v58 = vsel %vm1395_vm1, %v1681_v46, %v1683_v42  ;;  %v1928_v63 = vsel %vm1395_vm1, %v1925_v11, %v1927_v45  ;;  %v432_v9 = vmul.f32 %v2932_v31, %v2945_v41  ;;  %v3223_v44 = vld [vmem:[%s2928_s16 + $0x50] sm:$0xff] }
  0x3e   : > { %v500_v12 = vmul.f32 %v2939_v36, %v3190_v29  ;;  %v569_v19 = vmul.f32 %v2955_v48, %v2937_v35  ;;  %v1997_v4 = vadd.f32 %v1888_v13, %v1753_v25  ;;  %v1036_v55 = vadd.f32 %v951_v54, %v792_v2 }
  0x3f   : > { %v3218_v20 = vmul.f32 %v2955_v48, %v2942_v40  ;;  %v814_v33 = vmul.f32 %v2957_v50, %v2945_v41  ;;  %v464_v46 = vadd.f32 %v432_v9, %v396_v61  ;;  %v3227_v60 = vmul.f32 %v2957_v50, %v2972_v57 }
  0x40   : > { %v668_v11 = vrot.slane %v569_v19, 1  ;;  %v1058_v62 = vmul.f32 %v2959_v51, %v3190_v29  ;;  %2526 = vmatmul.mubr.f32.vlgmr.msra.gmra.mrb[0].mxu0 %v1997_v4  ;;  %v1280_v3 = vadd.f32 %v1195_v34, %v1036_v55  ;;  %v3234_v13 = vmul.f32 %v2959_v51, %v3223_v44  ;;  %v3267_v34 = vld [vmem:[%s2928_s16 + $0x108] sm:$0xff] }
  0x41   : > { %v669_v0 = vrot.slane %v3218_v20, 1  ;;  %v912_v8 = vrot.slane %v814_v33, 1  ;;  %v532_v5 = vadd.f32 %v500_v12, %v464_v46  ;;  %v913_v14 = vrot.slane %v3227_v60, 1 }
  0x42   : > { %v1156_v21 = vrot.slane %v1058_v62, 1  ;;  %v1302_v24 = vmul.f32 %v2961_v52, %v2937_v35  ;;  %v1525_v18 = vadd.f32 %v1440_v43, %v1280_v3  ;;  %v1157_v32 = vrot.slane %v3234_v13, 1 }
  0x43   : > { %v670_v17 = vsel %vm662_vm0, %v668_v11, %v669_v0  ;;  %v3245_v27 = vmul.f32 %v2961_v52, %v2942_v40  ;;  %v914_v22 = vsel %vm662_vm0, %v912_v8, %v913_v14  ;;  %v1547_v35 = vmul.f32 %v2969_v56, %v2945_v41  ;;  %v3295_v8 = vld [vmem:[%s2928_s16 + $0x110] sm:$0xff] }
  0x44   : > { %v777_v39 = vadd.f32 %v670_v17, %v532_v5  ;;  %v1401_v26 = vrot.slane %v1302_v24, 2  ;;  %v1769_v28 = vadd.f32 %v1684_v58, %v1525_v18  ;;  %v1158_v10 = vsel %vm662_vm0, %v1156_v21, %v1157_v32 }
  0x45   : > { %v1402_v38 = vrot.slane %v3245_v27, 2  ;;  %v3258_v53 = vmul.f32 %v2969_v56, %v2972_v57  ;;  %v1645_v45 = vrot.slane %v1547_v35, 2  ;;  %v1791_v47 = vmul.f32 %v2992_v1, %v3190_v29 }
  0x46   : > { %v1021_v42 = vadd.f32 %v914_v22, %v777_v39  ;;  %v3264_v54 = vmul.f32 %v2992_v1, %v3223_v44  ;;  %v2013_v61 = vadd.f32 %v1928_v63, %v1769_v28  ;;  %v412_v43 = vmul.f32 %v2930_v30, %v3013_v15 }
  0x47   : > { %v1403_v25 = vsel %vm1395_vm1, %v1401_v26, %v1402_v38  ;;  %v1646_v2 = vrot.slane %v3258_v53, 2  ;;  %v1889_v9 = vrot.slane %v1791_v47, 2  ;;  %v448_v19 = vmul.f32 %v2932_v31, %v3016_v16 }
  0x48   : > { %v1265_v58 = vadd.f32 %v1158_v10, %v1021_v42  ;;  %v1890_v12 = vrot.slane %v3264_v54, 2  ;;  %2550 = vmatmul.mubr.f32.vlgmr.msra.gmra.mrb[0].mxu1 %v2013_v61  ;;  %v516_v4 = vmul.f32 %v2939_v36, %v3267_v34  ;;  %v593_v55 = vmul.f32 %v2955_v48, %v3013_v15 }
  0x49   : > { %v1647_v63 = vsel %vm1395_vm1, %v1645_v45, %v1646_v2  ;;  %v3287_v33 = vmul.f32 %v2955_v48, %v3064_v49  ;;  %v480_v62 = vadd.f32 %v448_v19, %v412_v43  ;;  %v838_v3 = vmul.f32 %v2957_v50, %v3016_v16 }
  0x4a   : > { %v1510_v46 = vadd.f32 %v1403_v25, %v1265_v58  ;;  %v1891_v11 = vsel %vm1395_vm1, %v1889_v9, %v1890_v12  ;;  %v708_v5 = vrot.slane %v593_v55, 1  ;;  %v3300_v24 = vmul.f32 %v2957_v50, %v3068_v59 }
  0x4b   : > { %v709_v21 = vrot.slane %v3287_v33, 1  ;;  %v1082_v18 = vmul.f32 %v2959_v51, %v3267_v34  ;;  %v548_v39 = vadd.f32 %v516_v4, %v480_v62  ;;  %v952_v22 = vrot.slane %v838_v3, 1  ;;  %v3340_v3 = vld [vmem:[%s2928_s16 + $0x58] sm:$0x3] }
  0x4c   : > { %v1754_v17 = vadd.f32 %v1647_v63, %v1510_v46  ;;  %v3306_v26 = vmul.f32 %v2959_v51, %v3295_v8  ;;  %v953_v28 = vrot.slane %v3300_v24, 1  ;;  %v1326_v42 = vmul.f32 %v2961_v52, %v3013_v15 }
  0x4d   : > { %v710_v35 = vsel %vm662_vm0, %v708_v5, %v709_v21  ;;  %v1196_v10 = vrot.slane %v1082_v18, 1  ;;  %v3317_v25 = vmul.f32 %v2961_v52, %v3064_v49  ;;  %v1571_v9 = vmul.f32 %v2969_v56, %v3016_v16 }
  0x4e   : > { %v1998_v45 = vadd.f32 %v1891_v11, %v1754_v17  ;;  %v793_v47 = vadd.f32 %v710_v35, %v548_v39  ;;  %v1197_v61 = vrot.slane %v3306_v26, 1  ;;  %v954_v43 = vsel %vm662_vm0, %v952_v22, %v953_v28 }
  0x4f   : > { %v1441_v58 = vrot.slane %v1326_v42, 2  ;;  %v3326_v15 = vmul.f32 %v2969_v56, %v3068_v59  ;;  %v4879_v4 = vrot.slane %v3317_v25, 2  ;;  %v1815_v55 = vmul.f32 %v2992_v1, %v3267_v34 }
  0x50   : > { %2528 = vmatprep.mubr.f32.mxu0 %v1998_v45  ;;  %v1037_v19 = vadd.f32 %v954_v43, %v793_v47  ;;  %v1198_v63 = vsel %vm662_vm0, %v1196_v10, %v1197_v61  ;;  %v1685_v46 = vrot.slane %v1571_v9, 2  ;;  %v3337_v62 = vmul.f32 %v2992_v1, %v3295_v8 }
  0x51   : > { %v4878_v11 = vrot.slane %v3326_v15, 2  ;;  %v397_v5 = vmul.f32 %v2930_v30, %v2942_v40  ;;  %v1443_v17 = vsel %vm1395_vm1, %v1441_v58, %v4879_v4  ;;  %v1929_v39 = vrot.slane %v1815_v55, 2 }
  0x52   : > { %v1281_v18 = vadd.f32 %v1198_v63, %v1037_v19  ;;  %v433_v22 = vmul.f32 %v2932_v31, %v2972_v57  ;;  %v1930_v10 = vrot.slane %v3337_v62, 2  ;;  %v501_v42 = vmul.f32 %v2939_v36, %v3223_v44 }
  0x53   : > { %v1687_v35 = vsel %vm1395_vm1, %v1685_v46, %v4878_v11  ;;  %v571_v40 = vmul.f32 %v2955_v48, %v3107_v37  ;;  %v816_v43 = vmul.f32 %v2957_v50, %v3116_v23  ;;  %v1060_v58 = vmul.f32 %v2959_v51, %v3340_v3 }
  0x54   : > { %v1526_v45 = vadd.f32 %v1443_v17, %v1281_v18  ;;  %v465_v47 = vadd.f32 %v433_v22, %v397_v5  ;;  %v1931_v9 = vsel %vm1395_vm1, %v1929_v39, %v1930_v10  ;;  %v1304_v63 = vmul.f32 %v2961_v52, %v3107_v37 }
  0x55   : > { %v671_v19 = vrot.slane %v571_v40, 1  ;;  %v1549_v55 = vmul.f32 %v2969_v56, %v3116_v23  ;;  %v915_v18 = vrot.slane %v816_v43, 1  ;;  %v1159_v5 = vrot.slane %v1060_v58, 1 }
  0x56   : > { %v1770_v46 = vadd.f32 %v1687_v35, %v1526_v45  ;;  %v533_v62 = vadd.f32 %v501_v42, %v465_v47  ;;  %v1404_v22 = vrot.slane %v1304_v63, 2  ;;  %v1793_v39 = vmul.f32 %v2992_v1, %v3340_v3  ;;  %v3378_v42 = vld [vmem:[%s2928_s16 + $0x118] sm:$0x3] }
  0x57   : > { %v672_v17 = vsel %vm662_vm0, %v669_v0, %v671_v19  ;;  %v1648_v11 = vrot.slane %v1549_v55, 2  ;;  %v916_v37 = vsel %vm662_vm0, %v913_v14, %v915_v18  ;;  %v1160_v35 = vsel %vm662_vm0, %v1157_v32, %v1159_v5 }
  0x58   : > { %v2014_v40 = vadd.f32 %v1931_v9, %v1770_v46  ;;  %v778_v4 = vadd.f32 %v672_v17, %v533_v62  ;;  %v1405_v20 = vsel %vm1395_vm1, %v1402_v38, %v1404_v22  ;;  %v1892_v45 = vrot.slane %v1793_v39, 2 }
  0x59   : > { %v1649_v0 = vsel %vm1395_vm1, %v1646_v2, %v1648_v11  ;;  %v413_v60 = vmul.f32 %v2930_v30, %v3064_v49  ;;  %v449_v13 = vmul.f32 %v2932_v31, %v3068_v59  ;;  %v517_v32 = vmul.f32 %v2939_v36, %v3295_v8 }
  0x5a   : > { %2552 = vmatprep.mubr.f32.mxu1 %v2014_v40  ;;  %v1022_v14 = vadd.f32 %v916_v37, %v778_v4  ;;  %v595_v27 = vmul.f32 %v2955_v48, %v3159_v6  ;;  %v1893_v38 = vsel %vm1395_vm1, %v1890_v12, %v1892_v45  ;;  %v840_v53 = vmul.f32 %v2957_v50, %v3162_v7 }
  0x5b   : > { %v1084_v49 = vmul.f32 %v2959_v51, %v3378_v42  ;;  %v1328_v2 = vmul.f32 %v2961_v52, %v3159_v6  ;;  %v481_v11 = vadd.f32 %v449_v13, %v413_v60  ;;  %v1573_v43 = vmul.f32 %v2969_v56, %v3162_v7  ;;  %v3411_v6 = vld [vmem:[%s2928_s16 + $0x60] sm:$0xff] }
  0x5c   : > { %v1266_v4 = vadd.f32 %v1160_v35, %v1022_v14  ;;  %v711_v47 = vrot.slane %v595_v27, 1  ;;  %v955_v58 = vrot.slane %v840_v53, 1  ;;  %v1817_v12 = vmul.f32 %v2992_v1, %v3378_v42 }
  0x5d   : > { %v1199_v54 = vrot.slane %v1084_v49, 1  ;;  %v1444_v9 = vrot.slane %v1328_v2, 2  ;;  %v549_v63 = vadd.f32 %v517_v32, %v481_v11  ;;  %v1688_v46 = vrot.slane %v1573_v43, 2 }
  0x5e   : > { %v1511_v19 = vadd.f32 %v1405_v20, %v1266_v4  ;;  %v712_v55 = vsel %vm662_vm0, %v709_v21, %v711_v47  ;;  %v956_v62 = vsel %vm662_vm0, %v953_v28, %v955_v58  ;;  %v4892_v5 = vrot.slane %v3317_v25, 2 }
  0x5f   : > { %v1200_v18 = vsel %vm662_vm0, %v1197_v61, %v1199_v54  ;;  %v1932_v22 = vrot.slane %v1817_v12, 2  ;;  %v794_v39 = vadd.f32 %v712_v55, %v549_v63  ;;  %v4893_v21 = vrot.slane %v3326_v15, 2 }
  0x60   : > { %v1445_v17 = vsel %vm1395_vm1, %v4892_v5, %v1444_v9  ;;  %v1755_v33 = vadd.f32 %v1649_v0, %v1511_v19  ;;  %v398_v24 = vmul.f32 %v2930_v30, %v2945_v41  ;;  %v434_v26 = vmul.f32 %v2932_v31, %v3190_v29  ;;  %v3441_v0 = vld [vmem:[%s2928_s16 + $0x68] sm:$0xff] }
  0x61   : > { %v1689_v40 = vsel %vm1395_vm1, %v4893_v21, %v1688_v46  ;;  %v1933_v28 = vsel %vm1395_vm1, %v1930_v10, %v1932_v22  ;;  %v502_v61 = vmul.f32 %v2939_v36, %v3411_v6  ;;  %v572_v25 = vmul.f32 %v2955_v48, %v2945_v41  ;;  %v3485_v22 = vld [vmem:[%s2928_s16 + $0x120] sm:$0xff] }
  0x62   : > { %v1999_v37 = vadd.f32 %v1893_v38, %v1755_v33  ;;  %v1038_v35 = vadd.f32 %v956_v62, %v794_v39  ;;  %v3436_v15 = vmul.f32 %v2955_v48, %v2972_v57  ;;  %v817_v20 = vmul.f32 %v2957_v50, %v3190_v29 }
  0x63   : > { %v466_v10 = vadd.f32 %v434_v26, %v398_v24  ;;  %v673_v45 = vrot.slane %v572_v25, 1  ;;  %v3445_v60 = vmul.f32 %v2957_v50, %v3223_v44  ;;  %v1061_v14 = vmul.f32 %v2959_v51, %v3411_v6 }
  0x64   : > { %2529 = vmatmul.mubr.f32.gmra.mrb[2].mxu0 %v1999_v37  ;;  %v1282_v13 = vadd.f32 %v1200_v18, %v1038_v35  ;;  %v674_v32 = vrot.slane %v3436_v15, 1  ;;  %v917_v27 = vrot.slane %v817_v20, 1  ;;  %v3452_v38 = vmul.f32 %v2959_v51, %v3441_v0 }
  0x65   : > { %v534_v53 = vadd.f32 %v502_v61, %v466_v10  ;;  %v918_v49 = vrot.slane %v3445_v60, 1  ;;  %v1161_v2 = vrot.slane %v1061_v14, 1  ;;  %v1305_v4 = vmul.f32 %v2961_v52, %v2945_v41 }
  0x66   : > { %v1527_v11 = vadd.f32 %v1445_v17, %v1282_v13  ;;  %v675_v47 = vsel %vm662_vm0, %v673_v45, %v674_v32  ;;  %v1162_v43 = vrot.slane %v3452_v38, 1  ;;  %v3463_v58 = vmul.f32 %v2961_v52, %v2972_v57 }
  0x67   : > { %v779_v54 = vadd.f32 %v675_v47, %v534_v53  ;;  %v919_v9 = vsel %vm662_vm0, %v917_v27, %v918_v49  ;;  %v1406_v12 = vrot.slane %v1305_v4, 2  ;;  %v1550_v41 = vmul.f32 %v2969_v56, %v3190_v29  ;;  %v3513_v27 = vld [vmem:[%s2928_s16 + $0x128] sm:$0xff] }
  0x68   : > { %v1771_v19 = vadd.f32 %v1689_v40, %v1527_v11  ;;  %v1163_v63 = vsel %vm662_vm0, %v1161_v2, %v1162_v43  ;;  %v1407_v55 = vrot.slane %v3463_v58, 2  ;;  %v3476_v46 = vmul.f32 %v2969_v56, %v3223_v44 }
  0x69   : > { %v1023_v62 = vadd.f32 %v919_v9, %v779_v54  ;;  %v1650_v18 = vrot.slane %v1550_v41, 2  ;;  %v1794_v5 = vmul.f32 %v2992_v1, %v3411_v6  ;;  %v3482_v17 = vmul.f32 %v2992_v1, %v3441_v0 }
  0x6a   : > { %v2015_v33 = vadd.f32 %v1933_v28, %v1771_v19  ;;  %v1408_v39 = vsel %vm1395_vm1, %v1406_v12, %v1407_v55  ;;  %v1651_v21 = vrot.slane %v3476_v46, 2  ;;  %v414_v40 = vmul.f32 %v2930_v30, %v3016_v16 }
  0x6b   : > { %v1267_v24 = vadd.f32 %v1163_v63, %v1023_v62  ;;  %v1894_v26 = vrot.slane %v1794_v5, 2  ;;  %v1895_v61 = vrot.slane %v3482_v17, 2  ;;  %v450_v25 = vmul.f32 %v2932_v31, %v3267_v34 }
  0x6c   : > { %2553 = vmatmul.mubr.f32.gmra.mrb[2].mxu1 %v2015_v33  ;;  %v1652_v28 = vsel %vm1395_vm1, %v1650_v18, %v1651_v21  ;;  %v518_v37 = vmul.f32 %v2939_v36, %v3485_v22  ;;  %v596_v35 = vmul.f32 %v2955_v48, %v3016_v16  ;;  %v3505_v20 = vmul.f32 %v2955_v48, %v3068_v59 }
  0x6d   : > { %v1512_v10 = vadd.f32 %v1408_v39, %v1267_v24  ;;  %v1896_v45 = vsel %vm1395_vm1, %v1894_v26, %v1895_v61  ;;  %v482_v14 = vadd.f32 %v450_v25, %v414_v40  ;;  %v841_v13 = vmul.f32 %v2957_v50, %v3267_v34 }
  0x6e   : > { %v713_v53 = vrot.slane %v596_v35, 1  ;;  %v714_v2 = vrot.slane %v3505_v20, 1  ;;  %v3518_v4 = vmul.f32 %v2957_v50, %v3295_v8  ;;  %v1085_v11 = vmul.f32 %v2959_v51, %v3485_v22 }
  0x6f   : > { %v1756_v47 = vadd.f32 %v1652_v28, %v1512_v10  ;;  %v550_v54 = vadd.f32 %v518_v37, %v482_v14  ;;  %v957_v9 = vrot.slane %v841_v13, 1  ;;  %v3524_v12 = vmul.f32 %v2959_v51, %v3513_v27  ;;  %v3558_v13 = vld [vmem:[%s2928_s16 + $0x70] sm:$0x3] }
  0x70   : > { %v715_v41 = vsel %vm662_vm0, %v713_v53, %v714_v2  ;;  %v958_v19 = vrot.slane %v3518_v4, 1  ;;  %v1201_v63 = vrot.slane %v1085_v11, 1  ;;  %v1329_v62 = vmul.f32 %v2961_v52, %v3016_v16 }
  0x71   : > { %v2000_v18 = vadd.f32 %v1896_v45, %v1756_v47  ;;  %v795_v5 = vadd.f32 %v715_v41, %v550_v54  ;;  %v1202_v33 = vrot.slane %v3524_v12, 1  ;;  %v3535_v39 = vmul.f32 %v2961_v52, %v3068_v59 }
  0x72   : > { %v959_v40 = vsel %vm662_vm0, %v957_v9, %v958_v19  ;;  %v1446_v24 = vrot.slane %v1329_v62, 2  ;;  %v1574_v26 = vmul.f32 %v2969_v56, %v3267_v34  ;;  %v3544_v16 = vmul.f32 %v2969_v56, %v3295_v8 }
  0x73   : > { %2531 = vmatprep.mubr.f32.mxu0 %v2000_v18  ;;  %v1039_v25 = vadd.f32 %v959_v40, %v795_v5  ;;  %v1203_v28 = vsel %vm662_vm0, %v1201_v63, %v1202_v33  ;;  %v4881_v37 = vrot.slane %v3535_v39, 2  ;;  %v1818_v35 = vmul.f32 %v2992_v1, %v3485_v22 }
  0x74   : > { %v1690_v10 = vrot.slane %v1574_v26, 2  ;;  %v4880_v45 = vrot.slane %v3544_v16, 2  ;;  %v3555_v14 = vmul.f32 %v2992_v1, %v3513_v27  ;;  %v399_v53 = vmul.f32 %v2930_v30, %v2972_v57 }
  0x75   : > { %v1283_v11 = vadd.f32 %v1203_v28, %v1039_v25  ;;  %v1448_v47 = vsel %vm1395_vm1, %v1446_v24, %v4881_v37  ;;  %v1934_v54 = vrot.slane %v1818_v35, 2  ;;  %v435_v9 = vmul.f32 %v2932_v31, %v3223_v44 }
  0x76   : > { %v1692_v41 = vsel %vm1395_vm1, %v1690_v10, %v4880_v45  ;;  %v1935_v63 = vrot.slane %v3555_v14, 2  ;;  %v503_v62 = vmul.f32 %v2939_v36, %v3441_v0  ;;  %v574_v57 = vmul.f32 %v2955_v48, %v3116_v23 }
  0x77   : > { %v1528_v18 = vadd.f32 %v1448_v47, %v1283_v11  ;;  %v467_v5 = vadd.f32 %v435_v9, %v399_v53  ;;  %v819_v40 = vmul.f32 %v2957_v50, %v3340_v3  ;;  %v1063_v24 = vmul.f32 %v2959_v51, %v3558_v13 }
  0x78   : > { %v1936_v26 = vsel %vm1395_vm1, %v1934_v54, %v1935_v63  ;;  %v676_v25 = vrot.slane %v574_v57, 1  ;;  %v1307_v28 = vmul.f32 %v2961_v52, %v3116_v23  ;;  %v1552_v35 = vmul.f32 %v2969_v56, %v3340_v3 }
  0x79   : > { %v1772_v10 = vadd.f32 %v1692_v41, %v1528_v18  ;;  %v535_v14 = vadd.f32 %v503_v62, %v467_v5  ;;  %v920_v11 = vrot.slane %v819_v40, 1  ;;  %v1164_v53 = vrot.slane %v1063_v24, 1  ;;  %v3596_v62 = vld [vmem:[%s2928_s16 + $0x130] sm:$0x3] }
  0x7a   : > { %v677_v47 = vsel %vm662_vm0, %v674_v32, %v676_v25  ;;  %v1409_v9 = vrot.slane %v1307_v28, 2  ;;  %v1653_v45 = vrot.slane %v1552_v35, 2  ;;  %v1796_v54 = vmul.f32 %v2992_v1, %v3558_v13 }
  0x7b   : > { %v2016_v57 = vadd.f32 %v1936_v26, %v1772_v10  ;;  %v780_v37 = vadd.f32 %v677_v47, %v535_v14  ;;  %v921_v23 = vsel %vm662_vm0, %v918_v49, %v920_v11  ;;  %v1165_v41 = vsel %vm662_vm0, %v1162_v43, %v1164_v53 }
  0x7c   : > { %v1410_v15 = vsel %vm1395_vm1, %v1407_v55, %v1409_v9  ;;  %v1654_v32 = vsel %vm1395_vm1, %v1651_v21, %v1653_v45  ;;  %v1897_v18 = vrot.slane %v1796_v54, 2  ;;  %v415_v60 = vmul.f32 %v2930_v30, %v3068_v59 }
  0x7d   : > { %2555 = vmatprep.mubr.f32.mxu1 %v2016_v57  ;;  %v1024_v49 = vadd.f32 %v921_v23, %v780_v37  ;;  %v451_v38 = vmul.f32 %v2932_v31, %v3295_v8  ;;  %v519_v43 = vmul.f32 %v2939_v36, %v3513_v27  ;;  %v598_v58 = vmul.f32 %v2955_v48, %v3162_v7 }
  0x7e   : > { %v1898_v55 = vsel %vm1395_vm1, %v1895_v61, %v1897_v18  ;;  %v843_v46 = vmul.f32 %v2957_v50, %v3378_v42  ;;  %v1087_v59 = vmul.f32 %v2959_v51, %v3596_v62  ;;  %v1331_v21 = vmul.f32 %v2961_v52, %v3162_v7  ;;  %v3629_v7 = vld [vmem:[%s2928_s16 + $0x78] sm:$0xff] }
  0x7f   : > { %v1268_v37 = vadd.f32 %v1165_v41, %v1024_v49  ;;  %v483_v45 = vadd.f32 %v451_v38, %v415_v60  ;;  %v716_v5 = vrot.slane %v598_v58, 1  ;;  %v1576_v40 = vmul.f32 %v2969_v56, %v3378_v42 }
  0x80   : > { %v960_v24 = vrot.slane %v843_v46, 1  ;;  %v1204_v17 = vrot.slane %v1087_v59, 1  ;;  %v1449_v26 = vrot.slane %v1331_v21, 2  ;;  %v1820_v61 = vmul.f32 %v2992_v1, %v3596_v62 }
  0x81   : > { %v1513_v25 = vadd.f32 %v1410_v15, %v1268_v37  ;;  %v551_v28 = vadd.f32 %v519_v43, %v483_v45  ;;  %v717_v35 = vsel %vm662_vm0, %v714_v2, %v716_v5  ;;  %v1693_v10 = vrot.slane %v1576_v40, 2 }
  0x82   : > { %v961_v14 = vsel %vm662_vm0, %v958_v19, %v960_v24  ;;  %v1205_v11 = vsel %vm662_vm0, %v1202_v33, %v1204_v17  ;;  %v4894_v53 = vrot.slane %v3535_v39, 2  ;;  %v1937_v9 = vrot.slane %v1820_v61, 2 }
  0x83   : > { %v1757_v20 = vadd.f32 %v1654_v32, %v1513_v25  ;;  %v796_v54 = vadd.f32 %v717_v35, %v551_v28  ;;  %v4895_v2 = vrot.slane %v3544_v16, 2  ;;  %v400_v4 = vmul.f32 %v2930_v30, %v3190_v29  ;;  %v3659_v32 = vld [vmem:[%s2928_s16 + $0x80] sm:$0xff] }
  0x84   : > { %v1450_v47 = vsel %vm1395_vm1, %v4894_v53, %v1449_v26  ;;  %v1938_v19 = vsel %vm1395_vm1, %v1935_v63, %v1937_v9  ;;  %v436_v12 = vmul.f32 %v2932_v31, %v3411_v6  ;;  %v504_v33 = vmul.f32 %v2939_v36, %v3629_v7  ;;  %v3703_v9 = vld [vmem:[%s2928_s16 + $0x138] sm:$0xff] }
  0x85   : > { %v1694_v57 = vsel %vm1395_vm1, %v4895_v2, %v1693_v10  ;;  %v575_v39 = vmul.f32 %v2955_v48, %v3190_v29  ;;  %v2001_v23 = vadd.f32 %v1898_v55, %v1757_v20  ;;  %v1040_v41 = vadd.f32 %v961_v14, %v796_v54 }
  0x86   : > { %v3654_v16 = vmul.f32 %v2955_v48, %v3223_v44  ;;  %v820_v15 = vmul.f32 %v2957_v50, %v3411_v6  ;;  %v468_v63 = vadd.f32 %v436_v12, %v400_v4  ;;  %v3663_v60 = vmul.f32 %v2957_v50, %v3441_v0 }
  0x87   : > { %v678_v18 = vrot.slane %v575_v39, 1  ;;  %v1064_v49 = vmul.f32 %v2959_v51, %v3629_v7  ;;  %2532 = vmatmul.mubr.f32.gmra.mrb[4].mxu0 %v2001_v23  ;;  %v1284_v38 = vadd.f32 %v1205_v11, %v1040_v41  ;;  %v3670_v55 = vmul.f32 %v2959_v51, %v3659_v32 }
  0x88   : > { %v679_v43 = vrot.slane %v3654_v16, 1  ;;  %v922_v58 = vrot.slane %v820_v15, 1  ;;  %v536_v46 = vadd.f32 %v504_v33, %v468_v63  ;;  %v923_v59 = vrot.slane %v3663_v60, 1 }
  0x89   : > { %v1166_v21 = vrot.slane %v1064_v49, 1  ;;  %v1308_v37 = vmul.f32 %v2961_v52, %v3190_v29  ;;  %v1529_v45 = vadd.f32 %v1450_v47, %v1284_v38  ;;  %v1167_v40 = vrot.slane %v3670_v55, 1  ;;  %v3731_v38 = vld [vmem:[%s2928_s16 + $0x140] sm:$0xff] }
  0x8a   : > { %v680_v5 = vsel %vm662_vm0, %v678_v18, %v679_v43  ;;  %v3681_v24 = vmul.f32 %v2961_v52, %v3223_v44  ;;  %v924_v26 = vsel %vm662_vm0, %v922_v58, %v923_v59  ;;  %v1553_v29 = vmul.f32 %v2969_v56, %v3411_v6 }
  0x8b   : > { %v781_v17 = vadd.f32 %v680_v5, %v536_v46  ;;  %v1411_v61 = vrot.slane %v1308_v37, 2  ;;  %v1773_v25 = vadd.f32 %v1694_v57, %v1529_v45  ;;  %v1168_v28 = vsel %vm662_vm0, %v1166_v21, %v1167_v40 }
  0x8c   : > { %v1412_v35 = vrot.slane %v3681_v24, 2  ;;  %v3694_v10 = vmul.f32 %v2969_v56, %v3441_v0  ;;  %v1655_v11 = vrot.slane %v1553_v29, 2  ;;  %v1797_v53 = vmul.f32 %v2992_v1, %v3629_v7 }
  0x8d   : > { %v1025_v14 = vadd.f32 %v924_v26, %v781_v17  ;;  %v3700_v47 = vmul.f32 %v2992_v1, %v3659_v32  ;;  %v2017_v20 = vadd.f32 %v1938_v19, %v1773_v25  ;;  %v416_v57 = vmul.f32 %v2930_v30, %v3267_v34 }
  0x8e   : > { %v1413_v54 = vsel %vm1395_vm1, %v1411_v61, %v1412_v35  ;;  %v1656_v2 = vrot.slane %v3694_v10, 2  ;;  %v1899_v12 = vrot.slane %v1797_v53, 2  ;;  %v452_v1 = vmul.f32 %v2932_v31, %v3485_v22 }
  0x8f   : > { %v1269_v4 = vadd.f32 %v1168_v28, %v1025_v14  ;;  %v1900_v33 = vrot.slane %v3700_v47, 2  ;;  %2556 = vmatmul.mubr.f32.gmra.mrb[4].mxu1 %v2017_v20  ;;  %v520_v39 = vmul.f32 %v2939_v36, %v3703_v9  ;;  %v599_v23 = vmul.f32 %v2955_v48, %v3267_v34 }
  0x90   : > { %v1657_v19 = vsel %vm1395_vm1, %v1655_v11, %v1656_v2  ;;  %v3723_v41 = vmul.f32 %v2955_v48, %v3295_v8  ;;  %v484_v18 = vadd.f32 %v452_v1, %v416_v57  ;;  %v844_v49 = vmul.f32 %v2957_v50, %v3485_v22 }
  0x91   : > { %v1514_v15 = vadd.f32 %v1413_v54, %v1269_v4  ;;  %v1901_v63 = vsel %vm1395_vm1, %v1899_v12, %v1900_v33  ;;  %v718_v58 = vrot.slane %v599_v23, 1  ;;  %v3736_v21 = vmul.f32 %v2957_v50, %v3513_v27 }
  0x92   : > { %v719_v46 = vrot.slane %v3723_v41, 1  ;;  %v1088_v37 = vmul.f32 %v2959_v51, %v3703_v9  ;;  %v552_v5 = vadd.f32 %v520_v39, %v484_v18  ;;  %v962_v17 = vrot.slane %v844_v49, 1  ;;  %v3771_v39 = vld [vmem:[%s4874_s2 + $0x8] ss:$0 sm:$0xff] }
  0x93   : > { %v1758_v45 = vadd.f32 %v1657_v19, %v1514_v15  ;;  %v3742_v26 = vmul.f32 %v2959_v51, %v3731_v38  ;;  %v963_v29 = vrot.slane %v3736_v21, 1  ;;  %v1332_v28 = vmul.f32 %v2961_v52, %v3267_v34  ;;  %v3781_v49 = vld [vmem:[%s2928_s16 + $0x88] sm:$0x3] }
  0x94   : > { %v720_v61 = vsel %vm662_vm0, %v718_v58, %v719_v46  ;;  %v1206_v25 = vrot.slane %v1088_v37, 1  ;;  %v3753_v20 = vmul.f32 %v2961_v52, %v3295_v8  ;;  %v1577_v4 = vmul.f32 %v2969_v56, %v3485_v22 }
  0x95   : > { %v2002_v14 = vadd.f32 %v1901_v63, %v1758_v45  ;;  %v797_v11 = vadd.f32 %v720_v61, %v552_v5  ;;  %v1207_v53 = vrot.slane %v3742_v26, 1  ;;  %v964_v54 = vsel %vm662_vm0, %v962_v17, %v963_v29 }
  0x96   : > { %v1451_v57 = vrot.slane %v1332_v28, 2  ;;  %v3762_v34 = vmul.f32 %v2969_v56, %v3513_v27  ;;  %v4883_v19 = vrot.slane %v3753_v20, 2  ;;  %v1821_v23 = vmul.f32 %v3771_v39, %v3703_v9 }
  0x97   : > { %2534 = vmatprep.mubr.f32.mxu0 %v2002_v14  ;;  %v1041_v12 = vadd.f32 %v964_v54, %v797_v11  ;;  %v1208_v1 = vsel %vm662_vm0, %v1206_v25, %v1207_v53  ;;  %v1695_v15 = vrot.slane %v1577_v4, 2  ;;  %v3778_v18 = vmul.f32 %v3771_v39, %v3731_v38 }
  0x98   : > { %v4882_v63 = vrot.slane %v3762_v34, 2  ;;  %v401_v58 = vmul.f32 %v2930_v30, %v3223_v44  ;;  %v1453_v45 = vsel %vm1395_vm1, %v1451_v57, %v4883_v19  ;;  %v1939_v5 = vrot.slane %v1821_v23, 2 }
  0x99   : > { %v1285_v37 = vadd.f32 %v1208_v1, %v1041_v12  ;;  %v437_v17 = vmul.f32 %v2932_v31, %v3441_v0  ;;  %v1940_v25 = vrot.slane %v3778_v18, 2  ;;  %v505_v28 = vmul.f32 %v2939_v36, %v3659_v32 }
  0x9a   : > { %v1697_v61 = vsel %vm1395_vm1, %v1695_v15, %v4882_v63  ;;  %v577_v44 = vmul.f32 %v2955_v48, %v3340_v3  ;;  %v822_v54 = vmul.f32 %v2957_v50, %v3558_v13  ;;  %v1066_v57 = vmul.f32 %v2959_v51, %v3781_v49 }
  0x9b   : > { %v1530_v14 = vadd.f32 %v1453_v45, %v1285_v37  ;;  %v469_v11 = vadd.f32 %v437_v17, %v401_v58  ;;  %v1941_v4 = vsel %vm1395_vm1, %v1939_v5, %v1940_v25  ;;  %v1310_v1 = vmul.f32 %v2961_v52, %v3340_v3 }
  0x9c   : > { %v681_v12 = vrot.slane %v577_v44, 1  ;;  %v1555_v23 = vmul.f32 %v2969_v56, %v3558_v13  ;;  %v925_v37 = vrot.slane %v822_v54, 1  ;;  %v1169_v58 = vrot.slane %v1066_v57, 1 }
  0x9d   : > { %v1774_v15 = vadd.f32 %v1697_v61, %v1530_v14  ;;  %v537_v18 = vadd.f32 %v505_v28, %v469_v11  ;;  %v1414_v17 = vrot.slane %v1310_v1, 2  ;;  %v1799_v5 = vmul.f32 %v3771_v39, %v3781_v49  ;;  %v3819_v28 = vld [vmem:[%s2928_s16 + $0x148] sm:$0x3] }
  0x9e   : > { %v682_v45 = vsel %vm662_vm0, %v679_v43, %v681_v12  ;;  %v1658_v63 = vrot.slane %v1555_v23, 2  ;;  %v926_v3 = vsel %vm662_vm0, %v923_v59, %v925_v37  ;;  %v1170_v61 = vsel %vm662_vm0, %v1167_v40, %v1169_v58 }
  0x9f   : > { %v2018_v44 = vadd.f32 %v1941_v4, %v1774_v15  ;;  %v782_v19 = vadd.f32 %v682_v45, %v537_v18  ;;  %v1415_v16 = vsel %vm1395_vm1, %v1412_v35, %v1414_v17  ;;  %v1902_v14 = vrot.slane %v1799_v5, 2 }
  0xa0   : > { %v1659_v43 = vsel %vm1395_vm1, %v1656_v2, %v1658_v63  ;;  %v417_v60 = vmul.f32 %v2930_v30, %v3295_v8  ;;  %v453_v55 = vmul.f32 %v2932_v31, %v3513_v27  ;;  %v521_v40 = vmul.f32 %v2939_v36, %v3731_v38 }
  0xa1   : > { %2558 = vmatprep.mubr.f32.mxu1 %v2018_v44  ;;  %v1026_v59 = vadd.f32 %v926_v3, %v782_v19  ;;  %v601_v24 = vmul.f32 %v2955_v48, %v3378_v42  ;;  %v1903_v35 = vsel %vm1395_vm1, %v1900_v33, %v1902_v14  ;;  %v846_v10 = vmul.f32 %v2957_v50, %v3596_v62 }
  0xa2   : > { %v1090_v8 = vmul.f32 %v2959_v51, %v3819_v28  ;;  %v1334_v2 = vmul.f32 %v2961_v52, %v3378_v42  ;;  %v485_v63 = vadd.f32 %v453_v55, %v417_v60  ;;  %v1579_v54 = vmul.f32 %v2969_v56, %v3596_v62  ;;  %v3852_v42 = vld [vmem:[%s2928_s16 + $0x90] sm:$0xff] }
  0xa3   : > { %v1270_v19 = vadd.f32 %v1170_v61, %v1026_v59  ;;  %v721_v11 = vrot.slane %v601_v24, 1  ;;  %v965_v57 = vrot.slane %v846_v10, 1  ;;  %v1823_v33 = vmul.f32 %v3771_v39, %v3819_v28 }
  0xa4   : > { %v1209_v47 = vrot.slane %v1090_v8, 1  ;;  %v1454_v4 = vrot.slane %v1334_v2, 2  ;;  %v553_v1 = vadd.f32 %v521_v40, %v485_v63  ;;  %v1698_v15 = vrot.slane %v1579_v54, 2 }
  0xa5   : > { %v1515_v12 = vadd.f32 %v1415_v16, %v1270_v19  ;;  %v722_v23 = vsel %vm662_vm0, %v719_v46, %v721_v11  ;;  %v966_v18 = vsel %vm662_vm0, %v963_v29, %v965_v57  ;;  %v4896_v58 = vrot.slane %v3753_v20, 2 }
  0xa6   : > { %v1210_v37 = vsel %vm662_vm0, %v1207_v53, %v1209_v47  ;;  %v1942_v17 = vrot.slane %v1823_v33, 2  ;;  %v798_v5 = vadd.f32 %v722_v23, %v553_v1  ;;  %v4897_v46 = vrot.slane %v3762_v34, 2 }
  0xa7   : > { %v1455_v45 = vsel %vm1395_vm1, %v4896_v58, %v1454_v4  ;;  %v1759_v41 = vadd.f32 %v1659_v43, %v1515_v12  ;;  %v402_v21 = vmul.f32 %v2930_v30, %v3411_v6  ;;  %v438_v26 = vmul.f32 %v2932_v31, %v3629_v7  ;;  %v3882_v43 = vld [vmem:[%s2928_s16 + $0x98] sm:$0xff] }
  0xa8   : > { %v1699_v44 = vsel %vm1395_vm1, %v4897_v46, %v1698_v15  ;;  %v1943_v29 = vsel %vm1395_vm1, %v1940_v25, %v1942_v17  ;;  %v506_v53 = vmul.f32 %v2939_v36, %v3852_v42  ;;  %v578_v20 = vmul.f32 %v2955_v48, %v3411_v6  ;;  %v3926_v17 = vld [vmem:[%s2928_s16 + $0x150] sm:$0xff] }
  0xa9   : > { %v2003_v3 = vadd.f32 %v1903_v35, %v1759_v41  ;;  %v1042_v61 = vadd.f32 %v966_v18, %v798_v5  ;;  %v3877_v34 = vmul.f32 %v2955_v48, %v3441_v0  ;;  %v823_v16 = vmul.f32 %v2957_v50, %v3629_v7 }
  0xaa   : > { %v470_v25 = vadd.f32 %v438_v26, %v402_v21  ;;  %v683_v14 = vrot.slane %v578_v20, 1  ;;  %v3886_v60 = vmul.f32 %v2957_v50, %v3659_v32  ;;  %v1067_v59 = vmul.f32 %v2959_v51, %v3852_v42 }
  0xab   : > { %2535 = vmatmul.mubr.f32.gmra.mrb[6].mxu0 %v2003_v3  ;;  %v1286_v55 = vadd.f32 %v1210_v37, %v1042_v61  ;;  %v684_v40 = vrot.slane %v3877_v34, 1  ;;  %v927_v24 = vrot.slane %v823_v16, 1  ;;  %v3893_v35 = vmul.f32 %v2959_v51, %v3882_v43 }
  0xac   : > { %v538_v10 = vadd.f32 %v506_v53, %v470_v25  ;;  %v928_v8 = vrot.slane %v3886_v60, 1  ;;  %v1171_v2 = vrot.slane %v1067_v59, 1  ;;  %v1311_v19 = vmul.f32 %v2961_v52, %v3411_v6 }
  0xad   : > { %v1531_v63 = vadd.f32 %v1455_v45, %v1286_v55  ;;  %v685_v11 = vsel %vm662_vm0, %v683_v14, %v684_v40  ;;  %v1172_v54 = vrot.slane %v3893_v35, 1  ;;  %v3904_v57 = vmul.f32 %v2961_v52, %v3441_v0 }
  0xae   : > { %v783_v47 = vadd.f32 %v685_v11, %v538_v10  ;;  %v929_v4 = vsel %vm662_vm0, %v927_v24, %v928_v8  ;;  %v1416_v33 = vrot.slane %v1311_v19, 2  ;;  %v1556_v6 = vmul.f32 %v2969_v56, %v3629_v7  ;;  %v3954_v24 = vld [vmem:[%s2928_s16 + $0x158] sm:$0xff] }
  0xaf   : > { %v1775_v12 = vadd.f32 %v1699_v44, %v1531_v63  ;;  %v1173_v1 = vsel %vm662_vm0, %v1171_v2, %v1172_v54  ;;  %v1417_v23 = vrot.slane %v3904_v57, 2  ;;  %v3917_v15 = vmul.f32 %v2969_v56, %v3659_v32 }
  0xb0   : > { %v1027_v18 = vadd.f32 %v929_v4, %v783_v47  ;;  %v1660_v37 = vrot.slane %v1556_v6, 2  ;;  %v1800_v58 = vmul.f32 %v3771_v39, %v3852_v42  ;;  %v3923_v45 = vmul.f32 %v3771_v39, %v3882_v43 }
  0xb1   : > { %v2019_v41 = vadd.f32 %v1943_v29, %v1775_v12  ;;  %v1418_v5 = vsel %vm1395_vm1, %v1416_v33, %v1417_v23  ;;  %v1661_v46 = vrot.slane %v3917_v15, 2  ;;  %v418_v44 = vmul.f32 %v2930_v30, %v3485_v22 }
  0xb2   : > { %v1271_v21 = vadd.f32 %v1173_v1, %v1027_v18  ;;  %v1904_v26 = vrot.slane %v1800_v58, 2  ;;  %v1905_v53 = vrot.slane %v3923_v45, 2  ;;  %v454_v20 = vmul.f32 %v2932_v31, %v3703_v9 }
  0xb3   : > { %2559 = vmatmul.mubr.f32.gmra.mrb[6].mxu1 %v2019_v41  ;;  %v1662_v29 = vsel %vm1395_vm1, %v1660_v37, %v1661_v46  ;;  %v522_v3 = vmul.f32 %v2939_v36, %v3926_v17  ;;  %v602_v61 = vmul.f32 %v2955_v48, %v3485_v22  ;;  %v3946_v16 = vmul.f32 %v2955_v48, %v3513_v27 }
  0xb4   : > { %v1516_v25 = vadd.f32 %v1418_v5, %v1271_v21  ;;  %v1906_v14 = vsel %vm1395_vm1, %v1904_v26, %v1905_v53  ;;  %v486_v59 = vadd.f32 %v454_v20, %v418_v44  ;;  %v847_v55 = vmul.f32 %v2957_v50, %v3703_v9 }
  0xb5   : > { %v723_v10 = vrot.slane %v602_v61, 1  ;;  %v724_v2 = vrot.slane %v3946_v16, 1  ;;  %v3959_v19 = vmul.f32 %v2957_v50, %v3731_v38  ;;  %v1091_v63 = vmul.f32 %v2959_v51, %v3926_v17 }
  0xb6   : > { %v1760_v11 = vadd.f32 %v1662_v29, %v1516_v25  ;;  %v554_v47 = vadd.f32 %v522_v3, %v486_v59  ;;  %v967_v4 = vrot.slane %v847_v55, 1  ;;  %v3965_v33 = vmul.f32 %v2959_v51, %v3954_v24  ;;  %v3999_v55 = vld [vmem:[%s2928_s16 + $0xa0] sm:$0x3] }
  0xb7   : > { %v725_v6 = vsel %vm662_vm0, %v723_v10, %v724_v2  ;;  %v968_v12 = vrot.slane %v3959_v19, 1  ;;  %v1211_v1 = vrot.slane %v1091_v63, 1  ;;  %v1335_v18 = vmul.f32 %v2961_v52, %v3485_v22 }
  0xb8   : > { %v2004_v37 = vadd.f32 %v1906_v14, %v1760_v11  ;;  %v799_v58 = vadd.f32 %v725_v6, %v554_v47  ;;  %v1212_v41 = vrot.slane %v3965_v33, 1  ;;  %v3976_v5 = vmul.f32 %v2961_v52, %v3513_v27 }
  0xb9   : > { %v969_v44 = vsel %vm662_vm0, %v967_v4, %v968_v12  ;;  %v1456_v21 = vrot.slane %v1335_v18, 2  ;;  %v1580_v26 = vmul.f32 %v2969_v56, %v3703_v9  ;;  %v3985_v22 = vmul.f32 %v2969_v56, %v3731_v38 }
  0xba   : > { %2537 = vmatprep.mubr.f32.mxu0 %v2004_v37  ;;  %v1043_v20 = vadd.f32 %v969_v44, %v799_v58  ;;  %v1213_v29 = vsel %vm662_vm0, %v1211_v1, %v1212_v41  ;;  %v4885_v3 = vrot.slane %v3976_v5, 2  ;;  %v1824_v61 = vmul.f32 %v3771_v39, %v3926_v17 }
  0xbb   : > { %v1700_v25 = vrot.slane %v1580_v26, 2  ;;  %v4884_v14 = vrot.slane %v3985_v22, 2  ;;  %v3996_v59 = vmul.f32 %v3771_v39, %v3954_v24  ;;  %v403_v10 = vmul.f32 %v2930_v30, %v3441_v0 }
  0xbc   : > { %v1287_v63 = vadd.f32 %v1213_v29, %v1043_v20  ;;  %v1458_v11 = vsel %vm1395_vm1, %v1456_v21, %v4885_v3  ;;  %v1944_v47 = vrot.slane %v1824_v61, 2  ;;  %v439_v4 = vmul.f32 %v2932_v31, %v3659_v32 }
  0xbd   : > { %v1702_v6 = vsel %vm1395_vm1, %v1700_v25, %v4884_v14  ;;  %v1945_v1 = vrot.slane %v3996_v59, 2  ;;  %v507_v18 = vmul.f32 %v2939_v36, %v3882_v43  ;;  %v580_v0 = vmul.f32 %v2955_v48, %v3558_v13 }
  0xbe   : > { %v1532_v37 = vadd.f32 %v1458_v11, %v1287_v63  ;;  %v471_v58 = vadd.f32 %v439_v4, %v403_v10  ;;  %v825_v44 = vmul.f32 %v2957_v50, %v3781_v49  ;;  %v1069_v21 = vmul.f32 %v2959_v51, %v3999_v55 }
  0xbf   : > { %v1946_v26 = vsel %vm1395_vm1, %v1944_v47, %v1945_v1  ;;  %v686_v20 = vrot.slane %v580_v0, 1  ;;  %v1313_v29 = vmul.f32 %v2961_v52, %v3558_v13  ;;  %v1558_v61 = vmul.f32 %v2969_v56, %v3781_v49 }
  0xc0   : > { %v1776_v25 = vadd.f32 %v1702_v6, %v1532_v37  ;;  %v539_v59 = vadd.f32 %v507_v18, %v471_v58  ;;  %v930_v63 = vrot.slane %v825_v44, 1  ;;  %v1174_v10 = vrot.slane %v1069_v21, 1  ;;  %v4037_v18 = vld [vmem:[%s2928_s16 + $0x160] sm:$0x3] }
  0xc1   : > { %v687_v11 = vsel %vm662_vm0, %v684_v40, %v686_v20  ;;  %v1419_v4 = vrot.slane %v1313_v29, 2  ;;  %v1663_v14 = vrot.slane %v1558_v61, 2  ;;  %v1802_v47 = vmul.f32 %v3771_v39, %v3999_v55 }
  0xc2   : > { %v2020_v0 = vadd.f32 %v1946_v26, %v1776_v25  ;;  %v784_v3 = vadd.f32 %v687_v11, %v539_v59  ;;  %v931_v13 = vsel %vm662_vm0, %v928_v8, %v930_v63  ;;  %v1175_v6 = vsel %vm662_vm0, %v1172_v54, %v1174_v10 }
  0xc3   : > { %v1420_v34 = vsel %vm1395_vm1, %v1417_v23, %v1419_v4  ;;  %v1664_v40 = vsel %vm1395_vm1, %v1661_v46, %v1663_v14  ;;  %v1907_v37 = vrot.slane %v1802_v47, 2  ;;  %v419_v60 = vmul.f32 %v2930_v30, %v3513_v27 }
  0xc4   : > { %2561 = vmatprep.mubr.f32.mxu1 %v2020_v0  ;;  %v1028_v8 = vadd.f32 %v931_v13, %v784_v3  ;;  %v455_v35 = vmul.f32 %v2932_v31, %v3731_v38  ;;  %v523_v54 = vmul.f32 %v2939_v36, %v3954_v24  ;;  %v604_v57 = vmul.f32 %v2955_v48, %v3596_v62 }
  0xc5   : > { %v1908_v23 = vsel %vm1395_vm1, %v1905_v53, %v1907_v37  ;;  %v849_v15 = vmul.f32 %v2957_v50, %v3819_v28  ;;  %v1093_v27 = vmul.f32 %v2959_v51, %v4037_v18  ;;  %v1337_v46 = vmul.f32 %v2961_v52, %v3596_v62  ;;  %v4070_v62 = vld [vmem:[%s2928_s16 + $0xa8] sm:$0xff] }
  0xc6   : > { %v1272_v3 = vadd.f32 %v1175_v6, %v1028_v8  ;;  %v487_v14 = vadd.f32 %v455_v35, %v419_v60  ;;  %v726_v58 = vrot.slane %v604_v57, 1  ;;  %v1582_v44 = vmul.f32 %v2969_v56, %v3819_v28 }
  0xc7   : > { %v970_v21 = vrot.slane %v849_v15, 1  ;;  %v1214_v45 = vrot.slane %v1093_v27, 1  ;;  %v1459_v26 = vrot.slane %v1337_v46, 2  ;;  %v1826_v53 = vmul.f32 %v3771_v39, %v4037_v18 }
  0xc8   : > { %v1517_v20 = vadd.f32 %v1420_v34, %v1272_v3  ;;  %v555_v29 = vadd.f32 %v523_v54, %v487_v14  ;;  %v727_v61 = vsel %vm662_vm0, %v724_v2, %v726_v58  ;;  %v1703_v25 = vrot.slane %v1582_v44, 2 }
  0xc9   : > { %v971_v59 = vsel %vm662_vm0, %v968_v12, %v970_v21  ;;  %v1215_v63 = vsel %vm662_vm0, %v1212_v41, %v1214_v45  ;;  %v4898_v10 = vrot.slane %v3976_v5, 2  ;;  %v1947_v4 = vrot.slane %v1826_v53, 2 }
  0xca   : > { %v1761_v16 = vadd.f32 %v1664_v40, %v1517_v20  ;;  %v800_v47 = vadd.f32 %v727_v61, %v555_v29  ;;  %v4899_v2 = vrot.slane %v3985_v22, 2  ;;  %v404_v19 = vmul.f32 %v2930_v30, %v3629_v7  ;;  %v4100_v40 = vld [vmem:[%s2928_s16 + $0xb0] sm:$0xff] }
  0xcb   : > { %v1460_v11 = vsel %vm1395_vm1, %v4898_v10, %v1459_v26  ;;  %v1948_v12 = vsel %vm1395_vm1, %v1945_v1, %v1947_v4  ;;  %v440_v33 = vmul.f32 %v2932_v31, %v3852_v42  ;;  %v508_v41 = vmul.f32 %v2939_v36, %v4070_v62  ;;  %v4144_v4 = vld [vmem:[%s2928_s16 + $0x168] sm:$0xff] }
  0xcc   : > { %v1704_v0 = vsel %vm1395_vm1, %v4899_v2, %v1703_v25  ;;  %v581_v5 = vmul.f32 %v2955_v48, %v3629_v7  ;;  %v2005_v13 = vadd.f32 %v1908_v23, %v1761_v16  ;;  %v1044_v6 = vadd.f32 %v971_v59, %v800_v47 }
  0xcd   : > { %v4095_v22 = vmul.f32 %v2955_v48, %v3659_v32  ;;  %v826_v34 = vmul.f32 %v2957_v50, %v3852_v42  ;;  %v472_v1 = vadd.f32 %v440_v33, %v404_v19  ;;  %v4104_v60 = vmul.f32 %v2957_v50, %v3882_v43 }
  0xce   : > { %v688_v37 = vrot.slane %v581_v5, 1  ;;  %v1070_v8 = vmul.f32 %v2959_v51, %v4070_v62  ;;  %2538 = vmatmul.mubr.f32.gmra.mrb[8].mxu0 %v2005_v13  ;;  %v1288_v35 = vadd.f32 %v1215_v63, %v1044_v6  ;;  %v4111_v23 = vmul.f32 %v2959_v51, %v4100_v40 }
  0xcf   : > { %v689_v54 = vrot.slane %v4095_v22, 1  ;;  %v932_v57 = vrot.slane %v826_v34, 1  ;;  %v540_v15 = vadd.f32 %v508_v41, %v472_v1  ;;  %v933_v27 = vrot.slane %v4104_v60, 1 }
  0xd0   : > { %v1176_v46 = vrot.slane %v1070_v8, 1  ;;  %v1314_v3 = vmul.f32 %v2961_v52, %v3629_v7  ;;  %v1533_v14 = vadd.f32 %v1460_v11, %v1288_v35  ;;  %v1177_v44 = vrot.slane %v4111_v23, 1 }
  0xd1   : > { %v690_v58 = vsel %vm662_vm0, %v688_v37, %v689_v54  ;;  %v4122_v21 = vmul.f32 %v2961_v52, %v3659_v32  ;;  %v934_v26 = vsel %vm662_vm0, %v932_v57, %v933_v27  ;;  %v1559_v7 = vmul.f32 %v2969_v56, %v3852_v42  ;;  %v4172_v57 = vld [vmem:[%s2928_s16 + $0x170] sm:$0xff] }
  0xd2   : > { %v785_v45 = vadd.f32 %v690_v58, %v540_v15  ;;  %v1421_v53 = vrot.slane %v1314_v3, 2  ;;  %v1777_v20 = vadd.f32 %v1704_v0, %v1533_v14  ;;  %v1178_v29 = vsel %vm662_vm0, %v1176_v46, %v1177_v44 }
  0xd3   : > { %v1422_v61 = vrot.slane %v4122_v21, 2  ;;  %v4135_v25 = vmul.f32 %v2969_v56, %v3882_v43  ;;  %v1665_v63 = vrot.slane %v1559_v7, 2  ;;  %v1803_v10 = vmul.f32 %v3771_v39, %v4070_v62 }
  0xd4   : > { %v1029_v59 = vadd.f32 %v934_v26, %v785_v45  ;;  %v4141_v11 = vmul.f32 %v3771_v39, %v4100_v40  ;;  %v2021_v16 = vadd.f32 %v1948_v12, %v1777_v20  ;;  %v420_v0 = vmul.f32 %v2930_v30, %v3703_v9 }
  0xd5   : > { %v1423_v47 = vsel %vm1395_vm1, %v1421_v53, %v1422_v61  ;;  %v1666_v2 = vrot.slane %v4135_v25, 2  ;;  %v1909_v33 = vrot.slane %v1803_v10, 2  ;;  %v456_v5 = vmul.f32 %v2932_v31, %v3926_v17 }
  0xd6   : > { %v1273_v19 = vadd.f32 %v1178_v29, %v1029_v59  ;;  %v1910_v41 = vrot.slane %v4141_v11, 2  ;;  %2562 = vmatmul.mubr.f32.gmra.mrb[8].mxu1 %v2021_v16  ;;  %v524_v13 = vmul.f32 %v2939_v36, %v4144_v4  ;;  %v605_v6 = vmul.f32 %v2955_v48, %v3703_v9 }
  0xd7   : > { %v1667_v12 = vsel %vm1395_vm1, %v1665_v63, %v1666_v2  ;;  %v4164_v34 = vmul.f32 %v2955_v48, %v3731_v38  ;;  %v488_v8 = vadd.f32 %v456_v5, %v420_v0  ;;  %v850_v35 = vmul.f32 %v2957_v50, %v3926_v17 }
  0xd8   : > { %v1518_v1 = vadd.f32 %v1423_v47, %v1273_v19  ;;  %v1911_v37 = vsel %vm1395_vm1, %v1909_v33, %v1910_v41  ;;  %v728_v15 = vrot.slane %v605_v6, 1  ;;  %v4177_v3 = vmul.f32 %v2957_v50, %v3954_v24 }
  0xd9   : > { %v729_v46 = vrot.slane %v4164_v34, 1  ;;  %v1094_v14 = vmul.f32 %v2959_v51, %v4144_v4  ;;  %v556_v45 = vadd.f32 %v524_v13, %v488_v8  ;;  %v972_v26 = vrot.slane %v850_v35, 1  ;;  %v4217_v35 = vld [vmem:[%s2928_s16 + $0xb8] sm:$0x3] }
  0xda   : > { %v1762_v58 = vadd.f32 %v1667_v12, %v1518_v1  ;;  %v4183_v53 = vmul.f32 %v2959_v51, %v4172_v57  ;;  %v973_v20 = vrot.slane %v4177_v3, 1  ;;  %v1338_v59 = vmul.f32 %v2961_v52, %v3703_v9 }
  0xdb   : > { %v730_v7 = vsel %vm662_vm0, %v728_v15, %v729_v46  ;;  %v1216_v29 = vrot.slane %v1094_v14, 1  ;;  %v4194_v47 = vmul.f32 %v2961_v52, %v3731_v38  ;;  %v1583_v33 = vmul.f32 %v2969_v56, %v3926_v17 }
  0xdc   : > { %v2006_v63 = vadd.f32 %v1911_v37, %v1762_v58  ;;  %v801_v10 = vadd.f32 %v730_v7, %v556_v45  ;;  %v1217_v16 = vrot.slane %v4183_v53, 1  ;;  %v974_v0 = vsel %vm662_vm0, %v972_v26, %v973_v20 }
  0xdd   : > { %v1461_v19 = vrot.slane %v1338_v59, 2  ;;  %v4203_v9 = vmul.f32 %v2969_v56, %v3954_v24  ;;  %v4887_v13 = vrot.slane %v4194_v47, 2  ;;  %v1827_v6 = vmul.f32 %v3771_v39, %v4144_v4 }
  0xde   : > { %2540 = vmatprep.mubr.f32.mxu0 %v2006_v63  ;;  %v1045_v5 = vadd.f32 %v974_v0, %v801_v10  ;;  %v1218_v12 = vsel %vm662_vm0, %v1216_v29, %v1217_v16  ;;  %v1705_v1 = vrot.slane %v1583_v33, 2  ;;  %v4214_v8 = vmul.f32 %v3771_v39, %v4172_v57 }
  0xdf   : > { %v4886_v37 = vrot.slane %v4203_v9, 2  ;;  %v405_v15 = vmul.f32 %v2930_v30, %v3659_v32  ;;  %v1463_v58 = vsel %vm1395_vm1, %v1461_v19, %v4887_v13  ;;  %v1949_v45 = vrot.slane %v1827_v6, 2 }
  0xe0   : > { %v1289_v14 = vadd.f32 %v1218_v12, %v1045_v5  ;;  %v441_v26 = vmul.f32 %v2932_v31, %v3882_v43  ;;  %v1950_v29 = vrot.slane %v4214_v8, 2  ;;  %v509_v59 = vmul.f32 %v2939_v36, %v4100_v40 }
  0xe1   : > { %v1707_v7 = vsel %vm1395_vm1, %v1705_v1, %v4886_v37  ;;  %v583_v32 = vmul.f32 %v2955_v48, %v3781_v49  ;;  %v828_v0 = vmul.f32 %v2957_v50, %v3999_v55  ;;  %v1072_v19 = vmul.f32 %v2959_v51, %v4217_v35 }
  0xe2   : > { %v1534_v63 = vadd.f32 %v1463_v58, %v1289_v14  ;;  %v473_v10 = vadd.f32 %v441_v26, %v405_v15  ;;  %v1951_v33 = vsel %vm1395_vm1, %v1949_v45, %v1950_v29  ;;  %v1316_v12 = vmul.f32 %v2961_v52, %v3781_v49 }
  0xe3   : > { %v691_v5 = vrot.slane %v583_v32, 1  ;;  %v1561_v6 = vmul.f32 %v2969_v56, %v3999_v55  ;;  %v935_v14 = vrot.slane %v828_v0, 1  ;;  %v1179_v15 = vrot.slane %v1072_v19, 1 }
  0xe4   : > { %v1778_v1 = vadd.f32 %v1707_v7, %v1534_v63  ;;  %v541_v8 = vadd.f32 %v509_v59, %v473_v10  ;;  %v1424_v26 = vrot.slane %v1316_v12, 2  ;;  %v1805_v45 = vmul.f32 %v3771_v39, %v4217_v35  ;;  %v4255_v59 = vld [vmem:[%s2928_s16 + $0x178] sm:$0x3] }
  0xe5   : > { %v692_v58 = vsel %vm662_vm0, %v689_v54, %v691_v5  ;;  %v1668_v37 = vrot.slane %v1561_v6, 2  ;;  %v936_v49 = vsel %vm662_vm0, %v933_v27, %v935_v14  ;;  %v1180_v7 = vsel %vm662_vm0, %v1177_v44, %v1179_v15 }
  0xe6   : > { %v2022_v32 = vadd.f32 %v1951_v33, %v1778_v1  ;;  %v786_v13 = vadd.f32 %v692_v58, %v541_v8  ;;  %v1425_v22 = vsel %vm1395_vm1, %v1422_v61, %v1424_v26  ;;  %v1912_v63 = vrot.slane %v1805_v45, 2 }
  0xe7   : > { %v1669_v54 = vsel %vm1395_vm1, %v1666_v2, %v1668_v37  ;;  %v421_v60 = vmul.f32 %v2930_v30, %v3731_v38  ;;  %v457_v23 = vmul.f32 %v2932_v31, %v3954_v24  ;;  %v525_v44 = vmul.f32 %v2939_v36, %v4172_v57 }
  0xe8   : > { %2564 = vmatprep.mubr.f32.mxu1 %v2022_v32  ;;  %v1030_v27 = vadd.f32 %v936_v49, %v786_v13  ;;  %v607_v21 = vmul.f32 %v2955_v48, %v3819_v28  ;;  %v1913_v61 = vsel %vm1395_vm1, %v1910_v41, %v1912_v63  ;;  %v852_v25 = vmul.f32 %v2957_v50, %v4037_v18 }
  0xe9   : > { %v1096_v38 = vmul.f32 %v2959_v51, %v4255_v59  ;;  %v1340_v2 = vmul.f32 %v2961_v52, %v3819_v28  ;;  %v489_v37 = vadd.f32 %v457_v23, %v421_v60  ;;  %v1585_v0 = vmul.f32 %v2969_v56, %v4037_v18 }
  0xea   : > { %v1274_v13 = vadd.f32 %v1180_v7, %v1030_v27  ;;  %v731_v10 = vrot.slane %v607_v21, 1  ;;  %v975_v19 = vrot.slane %v852_v25, 1  ;;  %v1829_v41 = vmul.f32 %v3771_v39, %v4255_v59  ;;  %v4327_v21 = vld [vmem:[%s2928_s16 + $0xc8] sm:$0xff] }
  0xeb   : > { %v1219_v33 = vrot.slane %v1096_v38, 1  ;;  %v1464_v11 = vrot.slane %v1340_v2, 2  ;;  %v557_v12 = vadd.f32 %v525_v44, %v489_v37  ;;  %v1708_v28 = vrot.slane %v1585_v0, 2 }
  0xec   : > { %v1519_v5 = vadd.f32 %v1425_v22, %v1274_v13  ;;  %v732_v6 = vsel %vm662_vm0, %v729_v46, %v731_v10  ;;  %v976_v1 = vsel %vm662_vm0, %v973_v20, %v975_v19  ;;  %v4900_v14 = vrot.slane %v4194_v47, 2 }
  0xed   : > { %v1220_v8 = vsel %vm662_vm0, %v1217_v16, %v1219_v33  ;;  %v1952_v58 = vrot.slane %v1829_v41, 2  ;;  %v802_v45 = vadd.f32 %v732_v6, %v557_v12  ;;  %v4901_v34 = vrot.slane %v4203_v9, 2  ;;  %v4305_v16 = vld [vmem:[%s2928_s16 + $0xc0] sm:$0xff] }
  0xee   : > { %v1465_v15 = vsel %vm1395_vm1, %v4900_v14, %v1464_v11  ;;  %v1763_v26 = vadd.f32 %v1669_v54, %v1519_v5  ;;  %v406_v3 = vmul.f32 %v2930_v30, %v3852_v42  ;;  %v442_v53 = vmul.f32 %v2932_v31, %v4070_v62 }
  0xef   : > { %v1709_v46 = vsel %vm1395_vm1, %v4901_v34, %v1708_v28  ;;  %v1953_v20 = vsel %vm1395_vm1, %v1950_v29, %v1952_v58  ;;  %v510_v47 = vmul.f32 %v4305_v16, %v2939_v36  ;;  %v584_v9 = vmul.f32 %v2955_v48, %v3852_v42  ;;  %v4369_v58 = vld [vmem:[%s4347_s8] sm:$0xff] }
  0xf0   : > { %v2007_v32 = vadd.f32 %v1913_v61, %v1763_v26  ;;  %v1046_v49 = vadd.f32 %v976_v1, %v802_v45  ;;  %v4313_v7 = vmul.f32 %v2955_v48, %v3882_v43  ;;  %v829_v29 = vmul.f32 %v2957_v50, %v4070_v62 }
  0xf1   : > { %v474_v22 = vadd.f32 %v442_v53, %v406_v3  ;;  %v693_v54 = vrot.slane %v584_v9, 1  ;;  %v4319_v63 = vmul.f32 %v2957_v50, %v4100_v40  ;;  %v1073_v60 = vmul.f32 %v4305_v16, %v2959_v51 }
  0xf2   : > { %2541 = vmatmul.mubr.f32.gmra.mrb[10].mxu0 %v2007_v32  ;;  %v1290_v27 = vadd.f32 %v1220_v8, %v1046_v49  ;;  %v694_v23 = vrot.slane %v4313_v7, 1  ;;  %v937_v44 = vrot.slane %v829_v29, 1  ;;  %v4331_v61 = vmul.f32 %v4327_v21, %v2959_v51 }
  0xf3   : > { %v542_v25 = vadd.f32 %v510_v47, %v474_v22  ;;  %v938_v38 = vrot.slane %v4319_v63, 1  ;;  %v1181_v2 = vrot.slane %v1073_v60, 1  ;;  %v1317_v13 = vmul.f32 %v2961_v52, %v3852_v42 }
  0xf4   : > { %v1535_v37 = vadd.f32 %v1465_v15, %v1290_v27  ;;  %v695_v10 = vsel %vm662_vm0, %v693_v54, %v694_v23  ;;  %v1182_v0 = vrot.slane %v4331_v61, 1  ;;  %v4342_v19 = vmul.f32 %v2961_v52, %v3882_v43 }
  0xf5   : > { %v787_v33 = vadd.f32 %v695_v10, %v542_v25  ;;  %v939_v42 = vsel %vm662_vm0, %v937_v44, %v938_v38  ;;  %v1426_v11 = vrot.slane %v1317_v13, 2  ;;  %v1562_v41 = vmul.f32 %v2969_v56, %v4070_v62  ;;  %v4397_v44 = vld [vmem:[%s4347_s8 + $0x8] sm:$0xff] }
  0xf6   : > { %v1779_v5 = vadd.f32 %v1709_v46, %v1535_v37  ;;  %v1183_v12 = vsel %vm662_vm0, %v1181_v2, %v1182_v0  ;;  %v1427_v6 = vrot.slane %v4342_v19, 2  ;;  %v4360_v28 = vmul.f32 %v2969_v56, %v4100_v40 }
  0xf7   : > { %v1031_v1 = vadd.f32 %v939_v42, %v787_v33  ;;  %v1670_v8 = vrot.slane %v1562_v41, 2  ;;  %v1806_v14 = vmul.f32 %v4305_v16, %v3771_v39  ;;  %v4366_v15 = vmul.f32 %v4327_v21, %v3771_v39 }
  0xf8   : > { %v2023_v26 = vadd.f32 %v1953_v20, %v1779_v5  ;;  %v1428_v45 = vsel %vm1395_vm1, %v1426_v11, %v1427_v6  ;;  %v1671_v34 = vrot.slane %v4360_v28, 2  ;;  %v422_v46 = vmul.f32 %v2930_v30, %v3926_v17 }
  0xf9   : > { %v1275_v3 = vadd.f32 %v1183_v12, %v1031_v1  ;;  %v1914_v53 = vrot.slane %v1806_v14, 2  ;;  %v1915_v47 = vrot.slane %v4366_v15, 2  ;;  %v458_v9 = vmul.f32 %v2932_v31, %v4144_v4 }
  0xfa   : > { %2565 = vmatmul.mubr.f32.gmra.mrb[10].mxu1 %v2023_v26  ;;  %v1672_v20 = vsel %vm1395_vm1, %v1670_v8, %v1671_v34  ;;  %v526_v32 = vmul.f32 %v2939_v36, %v4369_v58  ;;  %v608_v49 = vmul.f32 %v2955_v48, %v3926_v17  ;;  %v4389_v29 = vmul.f32 %v2955_v48, %v3954_v24 }
  0xfb   : > { %v1520_v22 = vadd.f32 %v1428_v45, %v1275_v3  ;;  %v1916_v54 = vsel %vm1395_vm1, %v1914_v53, %v1915_v47  ;;  %v490_v60 = vadd.f32 %v458_v9, %v422_v46  ;;  %v853_v27 = vmul.f32 %v2957_v50, %v4144_v4 }
  0xfc   : > { %v733_v25 = vrot.slane %v608_v49, 1  ;;  %v734_v2 = vrot.slane %v4389_v29, 1  ;;  %v4402_v13 = vmul.f32 %v2957_v50, %v4172_v57  ;;  %v1097_v37 = vmul.f32 %v2959_v51, %v4369_v58 }
  0xfd   : > { %v1764_v10 = vadd.f32 %v1672_v20, %v1520_v22  ;;  %v558_v33 = vadd.f32 %v526_v32, %v490_v60  ;;  %v977_v42 = vrot.slane %v853_v27, 1  ;;  %v4408_v11 = vmul.f32 %v2959_v51, %v4397_v44 }
  0xfe   : > { %v735_v41 = vsel %vm662_vm0, %v733_v25, %v734_v2  ;;  %v978_v5 = vrot.slane %v4402_v13, 1  ;;  %v1221_v12 = vrot.slane %v1097_v37, 1  ;;  %v1341_v1 = vmul.f32 %v2961_v52, %v3926_v17 }
  0xff   : > { %v2008_v8 = vadd.f32 %v1916_v54, %v1764_v10  ;;  %v803_v14 = vadd.f32 %v735_v41, %v558_v33  ;;  %v1222_v26 = vrot.slane %v4408_v11, 1  ;;  %v4419_v45 = vmul.f32 %v2961_v52, %v3954_v24 }
 0x100   : > { %v979_v46 = vsel %vm662_vm0, %v977_v42, %v978_v5  ;;  %v1466_v3 = vrot.slane %v1341_v1, 2  ;;  %v1586_v53 = vmul.f32 %v2969_v56, %v4144_v4  ;;  %v4428_v9 = vmul.f32 %v2969_v56, %v4172_v57 }
 0x101   : > { %2543 = vmatprep.mubr.f32.mxu0 %v2008_v8  ;;  %v1047_v17 = vadd.f32 %v979_v46, %v803_v14  ;;  %v1223_v20 = vsel %vm662_vm0, %v1221_v12, %v1222_v26  ;;  %v4889_v32 = vrot.slane %v4419_v45, 2  ;;  %v1830_v49 = vmul.f32 %v3771_v39, %v4369_v58  ;;  %v4459_v46 = vld [vmem:[%s2928_s16 + $0xd0] sm:$0x3] }
 0x102   : > { %v1710_v22 = vrot.slane %v1586_v53, 2  ;;  %v4888_v54 = vrot.slane %v4428_v9, 2  ;;  %v4439_v60 = vmul.f32 %v3771_v39, %v4397_v44  ;;  %v407_v27 = vmul.f32 %v2930_v30, %v3882_v43 }
 0x103   : > { %v1291_v25 = vadd.f32 %v1223_v20, %v1047_v17  ;;  %v1468_v37 = vsel %vm1395_vm1, %v1466_v3, %v4889_v32  ;;  %v1954_v10 = vrot.slane %v1830_v49, 2  ;;  %v443_v33 = vmul.f32 %v2932_v31, %v4100_v40 }
 0x104   : > { %v1712_v42 = vsel %vm1395_vm1, %v1710_v22, %v4888_v54  ;;  %v1955_v41 = vrot.slane %v4439_v60, 2  ;;  %v511_v12 = vmul.f32 %v4327_v21, %v2939_v36  ;;  %v586_v43 = vmul.f32 %v2955_v48, %v3999_v55 }
 0x105   : > { %v1536_v1 = vadd.f32 %v1468_v37, %v1291_v25  ;;  %v475_v8 = vadd.f32 %v443_v33, %v407_v27  ;;  %v831_v14 = vmul.f32 %v2957_v50, %v4217_v35  ;;  %v1075_v3 = vmul.f32 %v4459_v46, %v2959_v51 }
 0x106   : > { %v1956_v53 = vsel %vm1395_vm1, %v1954_v10, %v1955_v41  ;;  %v696_v17 = vrot.slane %v586_v43, 1  ;;  %v1319_v20 = vmul.f32 %v2961_v52, %v3999_v55  ;;  %v1564_v49 = vmul.f32 %v2969_v56, %v4217_v35 }
 0x107   : > { %v1780_v22 = vadd.f32 %v1712_v42, %v1536_v1  ;;  %v543_v60 = vadd.f32 %v511_v12, %v475_v8  ;;  %v940_v27 = vrot.slane %v831_v14, 1  ;;  %v1184_v25 = vrot.slane %v1075_v3, 1  ;;  %v4480_v12 = vld [vmem:[%s4347_s8 + $0x10] sm:$0x3] }
 0x108   : > { %v697_v37 = vsel %vm662_vm0, %v694_v23, %v696_v17  ;;  %v1429_v33 = vrot.slane %v1319_v20, 2  ;;  %v1673_v54 = vrot.slane %v1564_v49, 2  ;;  %v1808_v10 = vmul.f32 %v4459_v46, %v3771_v39 }
 0x109   : > { %v2024_v43 = vadd.f32 %v1956_v53, %v1780_v22  ;;  %v788_v32 = vadd.f32 %v697_v37, %v543_v60  ;;  %v941_v55 = vsel %vm662_vm0, %v938_v38, %v940_v27  ;;  %v1185_v42 = vsel %vm662_vm0, %v1182_v0, %v1184_v25 }
 0x10a   : > { %v1430_v7 = vsel %vm1395_vm1, %v1427_v6, %v1429_v33  ;;  %v1674_v23 = vsel %vm1395_vm1, %v1671_v34, %v1673_v54  ;;  %v1917_v1 = vrot.slane %v1808_v10, 2  ;;  %v423_v63 = vmul.f32 %v2930_v30, %v3954_v24 }
 0x10b   : > { %2567 = vmatprep.mubr.f32.mxu1 %v2024_v43  ;;  %v1032_v38 = vadd.f32 %v941_v55, %v788_v32  ;;  %v459_v61 = vmul.f32 %v2932_v31, %v4172_v57  ;;  %v527_v0 = vmul.f32 %v2939_v36, %v4397_v44  ;;  %v610_v19 = vmul.f32 %v2955_v48, %v4037_v18 }
 0x10c   : > { %v1918_v6 = vsel %vm1395_vm1, %v1915_v47, %v1917_v1  ;;  %v855_v28 = vmul.f32 %v2957_v50, %v4255_v59  ;;  %v1099_v24 = vmul.f32 %v2959_v51, %v4480_v12  ;;  %v1343_v34 = vmul.f32 %v2961_v52, %v4037_v18 }
 0x10d   : > { %v1276_v32 = vadd.f32 %v1185_v42, %v1032_v38  ;;  %v491_v54 = vadd.f32 %v459_v61, %v423_v63  ;;  %v736_v8 = vrot.slane %v610_v19, 1  ;;  %v1588_v14 = vmul.f32 %v2969_v56, %v4255_v59 }
 0x10e   : > { %v980_v3 = vrot.slane %v855_v28, 1  ;;  %v1224_v53 = vrot.slane %v1099_v24, 1  ;;  %v1469_v15 = vrot.slane %v1343_v34, 2  ;;  %v1832_v47 = vmul.f32 %v3771_v39, %v4480_v12 }
 0x10f   : > { %v1521_v17 = vadd.f32 %v1430_v7, %v1276_v32  ;;  %v559_v20 = vadd.f32 %v527_v0, %v491_v54  ;;  %v737_v49 = vsel %vm662_vm0, %v734_v2, %v736_v8  ;;  %v1713_v18 = vrot.slane %v1588_v14, 2  ;;  %v4546_v0 = vld [vmem:[%s2928_s16 + $0xe0] sm:$0xff] }
 0x110   : > { %v981_v22 = vsel %vm662_vm0, %v978_v5, %v980_v3  ;;  %v1225_v60 = vsel %vm662_vm0, %v1222_v26, %v1224_v53  ;;  %v4902_v27 = vrot.slane %v4419_v45, 2  ;;  %v1957_v39 = vrot.slane %v1832_v47, 2  ;;  %v2685_v26 = vld [vmem:[%s2928_s16 + $0xd8] sm:$0xff] }
 0x111   : > { %v1765_v37 = vadd.f32 %v1674_v23, %v1521_v17  ;;  %v804_v33 = vadd.f32 %v737_v49, %v559_v20  ;;  %v4903_v29 = vrot.slane %v4428_v9, 2  ;;  %v408_v13 = vmul.f32 %v2930_v30, %v4070_v62 }
 0x112   : > { %v1470_v25 = vsel %vm1395_vm1, %v4902_v27, %v1469_v15  ;;  %v1958_v5 = vsel %vm1395_vm1, %v1955_v41, %v1957_v39  ;;  %v444_v11 = vmul.f32 %v4305_v16, %v2932_v31  ;;  %v512_v45 = vmul.f32 %v2685_v26, %v2939_v36 }
 0x113   : > { %v1714_v2 = vsel %vm1395_vm1, %v4903_v29, %v1713_v18  ;;  %v587_v10 = vmul.f32 %v2955_v48, %v4070_v62  ;;  %v2009_v43 = vadd.f32 %v1918_v6, %v1765_v37  ;;  %v1048_v55 = vadd.f32 %v981_v22, %v804_v33  ;;  %v4555_v32 = vpop.f32.mrb[0].mxu0  ;;  %v385_v37 = vld [vmem:[%s4347_s8 + $0x18] sm:$0xff] }
 0x114   : > { %v4535_v9 = vmul.f32 %v2955_v48, %v4100_v40  ;;  %v832_v42 = vmul.f32 %v4305_v16, %v2957_v50  ;;  %v476_v41 = vadd.f32 %v444_v11, %v408_v13  ;;  %v4541_v23 = vmul.f32 %v4327_v21, %v2957_v50  ;;  %v4565_v53 = vpop.f32.mrb[1].mxu0 }
 0x115   : > { %v698_v7 = vrot.slane %v587_v10, 1  ;;  %v1076_v1 = vmul.f32 %v2685_v26, %v2959_v51  ;;  %2544 = vmatmul.mubr.f32.gmra.mrb[12].mxu0 %v2009_v43  ;;  %v1292_v63 = vadd.f32 %v1225_v60, %v1048_v55  ;;  %v4550_v19 = vmul.f32 %v4546_v0, %v2959_v51 }
 0x116   : > { %v699_v38 = vrot.slane %v4535_v9, 1  ;;  %v942_v61 = vrot.slane %v832_v42, 1  ;;  %v544_v6 = vadd.f32 %v512_v45, %v476_v41  ;;  %v943_v28 = vrot.slane %v4541_v23, 1 }
 0x117   : > { %v1186_v24 = vrot.slane %v1076_v1, 1  ;;  %v1320_v34 = vmul.f32 %v2961_v52, %v4070_v62  ;;  %v1537_v54 = vadd.f32 %v1470_v25, %v1292_v63  ;;  %v1187_v14 = vrot.slane %v4550_v19, 1  ;;  %v4583_v25 = vld [vmem:[%s4874_s2 + $0x8] ss:$0 sm:$0xff] }
 0x118   : > { %v700_v8 = vsel %vm662_vm0, %v698_v7, %v699_v38  ;;  %v4563_v3 = vmul.f32 %v2961_v52, %v4100_v40  ;;  %v944_v62 = vsel %vm662_vm0, %v942_v61, %v943_v28  ;;  %v1565_v17 = vmul.f32 %v4305_v16, %v2969_v56  ;;  %v386_v61 = vld [vmem:[%s4347_s8 + $0x20] sm:$0xff] }
 0x119   : > { %v789_v15 = vadd.f32 %v700_v8, %v544_v6  ;;  %v1431_v47 = vrot.slane %v1320_v34, 2  ;;  %v1781_v20 = vadd.f32 %v1714_v2, %v1537_v54  ;;  %v1188_v49 = vsel %vm662_vm0, %v1186_v24, %v1187_v14 }
 0x11a   : > { %v1432_v18 = vrot.slane %v4563_v3, 2  ;;  %v4578_v22 = vmul.f32 %v4327_v21, %v2969_v56  ;;  %v1675_v27 = vrot.slane %v1565_v17, 2  ;;  %v1809_v16 = vmul.f32 %v4583_v25, %v2685_v26 }
 0x11b   : > { %v1033_v60 = vadd.f32 %v944_v62, %v789_v15  ;;  %v4588_v39 = vmul.f32 %v4583_v25, %v4546_v0  ;;  %v2025_v33 = vadd.f32 %v1958_v5, %v1781_v20  ;;  %v424_v13 = vmul.f32 %v2930_v30, %v4144_v4  ;;  %v4613_v63 = vpop.f32.mrb[0].mxu1 }
 0x11c   : > { %v1433_v29 = vsel %vm1395_vm1, %v1431_v47, %v1432_v18  ;;  %v1676_v2 = vrot.slane %v4578_v22, 2  ;;  %v1919_v45 = vrot.slane %v1809_v16, 2  ;;  %v460_v10 = vmul.f32 %v2932_v31, %v4369_v58  ;;  %v4623_v8 = vpop.f32.mrb[1].mxu1 }
 0x11d   : > { %v1277_v11 = vadd.f32 %v1188_v49, %v1033_v60  ;;  %v1920_v26 = vrot.slane %v4588_v39, 2  ;;  %2568 = vmatmul.mubr.f32.gmra.mrb[12].mxu1 %v2025_v33  ;;  %v528_v43 = vmul.f32 %v2939_v36, %v385_v37  ;;  %v611_v55 = vmul.f32 %v2955_v48, %v4144_v4 }
 0x11e   : > { %v1677_v5 = vsel %vm1395_vm1, %v1675_v27, %v1676_v2  ;;  %v492_v7 = vadd.f32 %v460_v10, %v424_v13  ;;  %v4611_v1 = vmul.f32 %v2955_v48, %v4172_v57  ;;  %v856_v24 = vmul.f32 %v2957_v50, %v4369_v58 }
 0x11f   : > { %v1522_v42 = vadd.f32 %v1433_v29, %v1277_v11  ;;  %v1921_v41 = vsel %vm1395_vm1, %v1919_v45, %v1920_v26  ;;  %v738_v6 = vrot.slane %v611_v55, 1  ;;  %v4620_v34 = vmul.f32 %v2957_v50, %v4397_v44 }
 0x120   : > { %v1100_v54 = vmul.f32 %v2959_v51, %v385_v37  ;;  %v560_v62 = vadd.f32 %v528_v43, %v492_v7  ;;  %v739_v47 = vrot.slane %v4611_v1, 1  ;;  %v4627_v17 = vmul.f32 %v2959_v51, %v386_v61 }
 0x121   : > { %v1766_v15 = vadd.f32 %v1677_v5, %v1522_v42  ;;  %v982_v20 = vrot.slane %v856_v24, 1  ;;  %v983_v49 = vrot.slane %v4620_v34, 1  ;;  %v1344_v27 = vmul.f32 %v2961_v52, %v4144_v4 }
 0x122   : > { %v1226_v60 = vrot.slane %v1100_v54, 1  ;;  %v740_v33 = vsel %vm662_vm0, %v738_v6, %v739_v47  ;;  %v1227_v29 = vrot.slane %v4627_v17, 1  ;;  %v4638_v13 = vmul.f32 %v2961_v52, %v4172_v57 }
 0x123   : > { %v2010_v16 = vadd.f32 %v1921_v41, %v1766_v15  ;;  %v805_v11 = vadd.f32 %v740_v33, %v560_v62  ;;  %v984_v45 = vsel %vm662_vm0, %v982_v20, %v983_v49  ;;  %v1471_v10 = vrot.slane %v1344_v27, 2 }
 0x124   : > { %v1589_v4 = vmul.f32 %v2969_v56, %v4369_v58  ;;  %v1228_v5 = vsel %vm662_vm0, %v1226_v60, %v1227_v29  ;;  %v1472_v43 = vrot.slane %v4638_v13, 2  ;;  %v4651_v55 = vmul.f32 %v2969_v56, %v4397_v44 }
 0x125   : > { %2546 = vmatprep.mubr.f32.mxu0 %v2010_v16  ;;  %v1833_v42 = vmul.f32 %v4583_v25, %v385_v37  ;;  %v1049_v41 = vadd.f32 %v984_v45, %v805_v11  ;;  %v4655_v6 = vmul.f32 %v4583_v25, %v386_v61  ;;  %v409_v58 = vmul.f32 %v2930_v30, %v4100_v40  ;;  %v2688_v11 = vld [vmem:[%s2928_s16 + $0xe8] sm:$0x3]  ;;  %s4744_s16 = scalar_lea.vmem [#allocation2], %s2432_s13 }
 0x126   : > { %v1715_v7 = vrot.slane %v1589_v4, 2  ;;  %v1473_v24 = vsel %vm1395_vm1, %v1471_v10, %v1472_v43  ;;  %v1716_v54 = vrot.slane %v4651_v55, 2  ;;  %v445_v62 = vmul.f32 %v4327_v21, %v2932_v31  ;;  %s2324_s24 = sshll.u32 %s4744_s16, 4  ;;  %s4819_s24 = int_to_ptr.vmem [resolvable:$true] %s2324_s24 }
 0x127   : > { %v1959_v15 = vrot.slane %v1833_v42, 2  ;;  %v1293_v37 = vadd.f32 %v1228_v5, %v1049_v41  ;;  %v1960_v20 = vrot.slane %v4655_v6, 2  ;;  %v513_v60 = vmul.f32 %v4546_v0, %v2939_v36  ;;  %s2689_s10 = scalar_lea.vmem %s4819_s24, 4096 }
 0x128   : > { %v589_v27 = vmul.f32 %v2955_v48, %v4217_v35  ;;  %v1717_v40 = vsel %vm1395_vm1, %v1715_v7, %v1716_v54  ;;  %v477_v16 = vadd.f32 %v445_v62, %v409_v58  ;;  %v834_v33 = vmul.f32 %v4459_v46, %v2957_v50  ;;  %p2690_p12 = scmp.ne.s32.totalorder %s4819_s24, %s2689_s10 }
 0x129   : > { %v1078_v21 = vmul.f32 %v2688_v11, %v2959_v51  ;;  %v1538_v45 = vadd.f32 %v1473_v24, %v1293_v37  ;;  %v1961_v0 = vsel %vm1395_vm1, %v1959_v15, %v1960_v20  ;;  %v1322_v4 = vmul.f32 %v2961_v52, %v4217_v35 }
 0x12a   : > { %v701_v10 = vrot.slane %v589_v27, 1  ;;  %v545_v5 = vadd.f32 %v513_v60, %v477_v16  ;;  %v945_v42 = vrot.slane %v834_v33, 1  ;;  %v1567_v7 = vmul.f32 %v4459_v46, %v2969_v56  ;;  %v387_v60 = vld [vmem:[%s4347_s8 + $0x28] sm:$0x3]  ;;  %p2691_p13 = pnand %p2690_p12, %p2842_p4  ;;  %s2693_s8 = sshll.u32 %s2769_s7, 4  ;;  %s2694_s8 = int_to_ptr.vmem [resolvable:$false] %s2693_s8 }
 0x12b   : > { %v1189_v41 = vrot.slane %v1078_v21, 1  ;;  %v1782_v58 = vadd.f32 %v1717_v40, %v1538_v45  ;;  %v1434_v62 = vrot.slane %v1322_v4, 2  ;;  %v1811_v37 = vmul.f32 %v2688_v11, %v4583_v25  ;;  %s2695_s9 = scalar_lea.vmem %s2694_s8, 8192  ;;  %p2696_p1 = scmp.lt.s32.totalorder %s4819_s24, %s2694_s8 }
 0x12c   : > { %v702_v24 = vsel %vm662_vm0, %v699_v38, %v701_v10  ;;  %v529_v15 = vmul.f32 %v2939_v36, %v386_v61  ;;  %v946_v35 = vsel %vm662_vm0, %v943_v28, %v945_v42  ;;  %v1678_v40 = vrot.slane %v1567_v7, 2  ;;  %p2692_p0 = pneg %p2691_p13  ;;  %p2697_p2 = scmp.lt.s32.totalorder %s2695_s9, %s2689_s10 }
 0x12d   : > { %v790_v27 = vadd.f32 %v702_v24, %v545_v5  ;;  %v2026_v16 = vadd.f32 %v1961_v0, %v1782_v58  ;;  %v1190_v46 = vsel %vm662_vm0, %v1187_v14, %v1189_v41  ;;  %v425_v9 = vmul.f32 %v2930_v30, %v4172_v57 }
 0x12e   : > { %v1435_v36 = vsel %vm1395_vm1, %v1432_v18, %v1434_v62  ;;  %v461_v23 = vmul.f32 %v2932_v31, %v4397_v44  ;;  %v613_v28 = vmul.f32 %v2955_v48, %v4255_v59  ;;  %v1922_v19 = vrot.slane %v1811_v37, 2  ;;  %p2698_p3 = por %p2697_p2, %p2696_p1 }
 0x12f   : > { %v1034_v38 = vadd.f32 %v946_v35, %v790_v27  ;;  %2570 = vmatprep.mubr.f32.mxu1 %v2026_v16  ;;  %v858_v14 = vmul.f32 %v2957_v50, %v4480_v12  ;;  %v1102_v61 = vmul.f32 %v2959_v51, %v387_v60  ;;  %v1346_v30 = vmul.f32 %v2961_v52, %v4255_v59  ;;  %v4721_v50 = vld [vmem:[%s4876_s4] ss:$0 sm:$0xff] }
 0x130   : > { %v493_v3 = vadd.f32 %v461_v23, %v425_v9  ;;  %v741_v33 = vrot.slane %v613_v28, 1  ;;  %v1591_v18 = vmul.f32 %v2969_v56, %v4480_v12  ;;  %v1679_v31 = vsel %vm1395_vm1, %v1676_v2, %v1678_v40  ;;  %p2699_p5 = pnand %p2698_p3, %p2692_p0 }
 0x131   : > { %v1278_v57 = vadd.f32 %v1190_v46, %v1034_v38  ;;  %v985_v48 = vrot.slane %v858_v14, 1  ;;  %v1229_v44 = vrot.slane %v1102_v61, 1  ;;  %v1923_v56 = vsel %vm1395_vm1, %v1920_v26, %v1922_v19 }
 0x132   : > { %v561_v52 = vadd.f32 %v529_v15, %v493_v3  ;;  %v742_v59 = vsel %vm662_vm0, %v739_v47, %v741_v33  ;;  %v1474_v22 = vrot.slane %v1346_v30, 2  ;;  %v1835_v2 = vmul.f32 %v4583_v25, %v387_v60 }
 0x133   : > { %v1523_v51 = vadd.f32 %v1435_v36, %v1278_v57  ;;  %v986_v12 = vsel %vm662_vm0, %v983_v49, %v985_v48  ;;  %v1718_v45 = vrot.slane %v1591_v18, 2  ;;  %v2123_v0 = vadd.f32 %v4555_v32, %v4721_v50 }
 0x134   : > { %v806_v21 = vadd.f32 %v742_v59, %v561_v52  ;;  %v1230_v1 = vsel %vm662_vm0, %v1227_v29, %v1229_v44  ;;  %v2203_v39 = vadd.f32 %v4613_v63, %v4721_v50  ;;  %v2118_v26 = vadd.f32 %v4721_v50, %v4565_v53 }
 0x135   : > { %v1767_v11 = vadd.f32 %v1679_v31, %v1523_v51  ;;  %v2198_v34 = vadd.f32 %v4721_v50, %v4623_v8  ;;  %2277 = vst [vmem:[%s4744_s16 + $0x8] sm:$0xff] %v2123_v0  ;;  %v1475_v32 = vsel %vm1395_vm1, %v1472_v43, %v1474_v22  ;;  %v1962_v63 = vrot.slane %v1835_v2, 2 }
 0x136   : > { %v1050_v47 = vadd.f32 %v986_v12, %v806_v21  ;;  %2293 = vst [vmem:[%s4744_s16 + $0x88] sm:$0xff] %v2203_v39  ;;  %2276 = vst [vmem:[%s4744_s16] sm:$0xff] %v2118_v26  ;;  %v1719_v8 = vsel %vm1395_vm1, %v1716_v54, %v1718_v45 }
 0x137   : > { %v2011_v25 = vadd.f32 %v1923_v56, %v1767_v11  ;;  %2292 = vst [vmem:[%s4744_s16 + $0x80] sm:$0xff] %v2198_v34  ;;  %v2530_v17 = vpop.f32.mrb[2].mxu0  ;;  %v1963_v43 = vsel %vm1395_vm1, %v1960_v20, %v1962_v63 }
 0x138   : > { %v1294_v53 = vadd.f32 %v1230_v1, %v1050_v47  ;;  %v2133_v29 = vadd.f32 %v2530_v17, %v4721_v50  ;;  %v2127_v13 = vpop.f32.mrb[3].mxu0 }
 0x139   : > { %2547 = vmatmul.mubr.f32.gmra.mrb[14].mxu0 %v2011_v25  ;;  %v2128_v10 = vadd.f32 %v4721_v50, %v2127_v13 }
 0x13a   : > { %v1539_v49 = vadd.f32 %v1475_v32, %v1294_v53  ;;  %2279 = vst [vmem:[%s4744_s16 + $0x18] sm:$0xff] %v2133_v29 }
 0x13b   : > { %2278 = vst [vmem:[%s4744_s16 + $0x10] sm:$0xff] %v2128_v10 }
 0x13c   : > { %v1783_v4 = vadd.f32 %v1719_v8, %v1539_v49 }
 0x13e   : > { %v2027_v55 = vadd.f32 %v1963_v43, %v1783_v4 }
 0x13f   : > { %v2554_v54 = vpop.f32.mrb[2].mxu1 }
 0x140   : > { %2571 = vmatmul.mubr.f32.gmra.mrb[14].mxu1 %v2027_v55  ;;  %v2213_v5 = vadd.f32 %v2554_v54, %v4721_v50  ;;  %v2207_v42 = vpop.f32.mrb[3].mxu1 }
 0x141   : > { %v2208_v41 = vadd.f32 %v4721_v50, %v2207_v42 }
 0x142   : > { %2295 = vst [vmem:[%s4744_s16 + $0x98] sm:$0xff] %v2213_v5 }
 0x143   : > { %2294 = vst [vmem:[%s4744_s16 + $0x90] sm:$0xff] %v2208_v41 }
 0x15a   : > { %v2533_v6 = vpop.f32.mrb[4].mxu0 }
 0x15b   : > { %v2143_v20 = vadd.f32 %v2533_v6, %v4721_v50  ;;  %v2137_v7 = vpop.f32.mrb[5].mxu0 }
 0x15c   : > { %v2138_v58 = vadd.f32 %v4721_v50, %v2137_v7 }
 0x15d   : > { %2281 = vst [vmem:[%s4744_s16 + $0x28] sm:$0xff] %v2143_v20 }
 0x15e   : > { %2280 = vst [vmem:[%s4744_s16 + $0x20] sm:$0xff] %v2138_v58 }
 0x162   : > { %v2557_v24 = vpop.f32.mrb[4].mxu1 }
 0x163   : > { %v2223_v62 = vadd.f32 %v2557_v24, %v4721_v50  ;;  %v2217_v37 = vpop.f32.mrb[5].mxu1 }
 0x164   : > { %v2218_v15 = vadd.f32 %v4721_v50, %v2217_v37 }
 0x165   : > { %2297 = vst [vmem:[%s4744_s16 + $0xa8] sm:$0xff] %v2223_v62 }
 0x166   : > { %2296 = vst [vmem:[%s4744_s16 + $0xa0] sm:$0xff] %v2218_v15 }
 0x17e   : > { %v2536_v27 = vpop.f32.mrb[6].mxu0 }
 0x17f   : > { %v2153_v35 = vadd.f32 %v2536_v27, %v4721_v50  ;;  %v2147_v60 = vpop.f32.mrb[7].mxu0 }
 0x180   : > { %v2148_v16 = vadd.f32 %v4721_v50, %v2147_v60 }
 0x181   : > { %2283 = vst [vmem:[%s4744_s16 + $0x38] sm:$0xff] %v2153_v35 }
 0x182   : > { %2282 = vst [vmem:[%s4744_s16 + $0x30] sm:$0xff] %v2148_v16 }
 0x186   : > { %v2560_v46 = vpop.f32.mrb[6].mxu1 }
 0x187   : > { %v2233_v40 = vadd.f32 %v2560_v46, %v4721_v50  ;;  %v2227_v9 = vpop.f32.mrb[7].mxu1 }
 0x188   : > { %v2228_v38 = vadd.f32 %v4721_v50, %v2227_v9 }
 0x189   : > { %2299 = vst [vmem:[%s4744_s16 + $0xb8] sm:$0xff] %v2233_v40 }
 0x18a   : > { %2298 = vst [vmem:[%s4744_s16 + $0xb0] sm:$0xff] %v2228_v38 }
 0x1a1   : > { %v2539_v36 = vpop.f32.mrb[8].mxu0 }
 0x1a2   : > { %v2163_v23 = vadd.f32 %v2539_v36, %v4721_v50  ;;  %v2157_v28 = vpop.f32.mrb[9].mxu0 }
 0x1a3   : > { %v2158_v19 = vadd.f32 %v4721_v50, %v2157_v28 }
 0x1a4   : > { %2285 = vst [vmem:[%s4744_s16 + $0x48] sm:$0xff] %v2163_v23 }
 0x1a5   : > { %2284 = vst [vmem:[%s4744_s16 + $0x40] sm:$0xff] %v2158_v19 }
 0x1a9   : > { %v2563_v14 = vpop.f32.mrb[8].mxu1 }
 0x1aa   : > { %v2243_v61 = vadd.f32 %v2563_v14, %v4721_v50  ;;  %v2237_v30 = vpop.f32.mrb[9].mxu1 }
 0x1ab   : > { %v2238_v57 = vadd.f32 %v4721_v50, %v2237_v30 }
 0x1ac   : > { %2301 = vst [vmem:[%s4744_s16 + $0xc8] sm:$0xff] %v2243_v61 }
 0x1ad   : > { %2300 = vst [vmem:[%s4744_s16 + $0xc0] sm:$0xff] %v2238_v57 }
 0x1c5   : > { %v2542_v3 = vpop.f32.mrb[10].mxu0 }
 0x1c6   : > { %v2173_v33 = vadd.f32 %v2542_v3, %v4721_v50  ;;  %v2167_v18 = vpop.f32.mrb[11].mxu0 }
 0x1c7   : > { %v2168_v31 = vadd.f32 %v4721_v50, %v2167_v18 }
 0x1c8   : > { %2287 = vst [vmem:[%s4744_s16 + $0x58] sm:$0xff] %v2173_v33 }
 0x1c9   : > { %2286 = vst [vmem:[%s4744_s16 + $0x50] sm:$0xff] %v2168_v31 }
 0x1cd   : > { %v2566_v48 = vpop.f32.mrb[10].mxu1 }
 0x1ce   : > { %v2253_v44 = vadd.f32 %v2566_v48, %v4721_v50  ;;  %v2247_v51 = vpop.f32.mrb[11].mxu1 }
 0x1cf   : > { %v2248_v52 = vadd.f32 %v4721_v50, %v2247_v51 }
 0x1d0   : > { %2303 = vst [vmem:[%s4744_s16 + $0xd8] sm:$0xff] %v2253_v44 }
 0x1d1   : > { %2302 = vst [vmem:[%s4744_s16 + $0xd0] sm:$0xff] %v2248_v52 }
 0x1e8   : > { %v2545_v59 = vpop.f32.mrb[12].mxu0 }
 0x1e9   : > { %v2183_v56 = vadd.f32 %v2545_v59, %v4721_v50  ;;  %v2177_v12 = vpop.f32.mrb[13].mxu0 }
 0x1ea   : > { %v2178_v22 = vadd.f32 %v4721_v50, %v2177_v12 }
 0x1eb   : > { %2289 = vst [vmem:[%s4744_s16 + $0x68] sm:$0xff] %v2183_v56 }
 0x1ec   : > { %2288 = vst [vmem:[%s4744_s16 + $0x60] sm:$0xff] %v2178_v22 }
 0x1f0   : > { %v2569_v2 = vpop.f32.mrb[12].mxu1 }
 0x1f1   : > { %v2263_v11 = vadd.f32 %v2569_v2, %v4721_v50  ;;  %v2257_v21 = vpop.f32.mrb[13].mxu1 }
 0x1f2   : > { %v2258_v45 = vadd.f32 %v4721_v50, %v2257_v21 }
 0x1f3   : > { %2305 = vst [vmem:[%s4744_s16 + $0xe8] sm:$0xff] %v2263_v11 }
 0x1f4   : > { %2304 = vst [vmem:[%s4744_s16 + $0xe0] sm:$0xff] %v2258_v45 }
 0x20c   : > { %v2548_v0 = vpop.f32.mrb[14].mxu0 }
 0x20d   : > { %v2193_v1 = vadd.f32 %v2548_v0, %v4721_v50  ;;  %v2187_v39 = vpop.f32.mrb[15].mxu0 }
 0x20e   : > { %v2188_v26 = vadd.f32 %v4721_v50, %v2187_v39 }
 0x20f   : > { %2291 = vst [vmem:[%s4744_s16 + $0x78] sm:$0xff] %v2193_v1 }
 0x210   : > { %2290 = vst [vmem:[%s4744_s16 + $0x70] sm:$0xff] %v2188_v26 }
 0x213   : > { %v2572_v34 = vpop.f32.mrb[14].mxu1 }
 0x214   : > { %v2273_v25 = vadd.f32 %v2572_v34, %v4721_v50  ;;  %v2267_v47 = vpop.f32.mrb[15].mxu1 }
 0x215   : > { %v2268_v32 = vadd.f32 %v4721_v50, %v2267_v47 }
 0x216   : > { %2307 = vst [vmem:[%s4744_s16 + $0xf8] sm:$0xff] %v2273_v25 }
 0x217   : > { %2306 = vst [vmem:[%s4744_s16 + $0xf0] sm:$0xff] %v2268_v32 }
 0x218   : > { %2702 = shalt.err (!%p2699_p5)
}
 0x219   : > { %s2703_s11 = scalar_lea.hbm %s4817_s29, 4096  ;;  %s2707_s14 = scalar_lea.hbm %s4877_s5, 8192 }
 0x21a   : > { %p2704_p6 = scmp.ne.s32.totalorder %s4817_s29, %s2703_s11  ;;  %p2708_p10 = scmp.lt.u32.totalorder %s4817_s29, %s4877_s5 }
 0x21b   : > { %p2709_p11 = scmp.lt.u32.totalorder %s2707_s14, %s2703_s11  ;;  %p2711_p13 = scmp.lt.u32.totalorder %s2703_s11, %s4817_s29 }
 0x21c   : > { %p2705_p7 = pnand %p2704_p6, %p2842_p4 }
 0x21d   : > { %p2710_p12 = por %p2709_p11, %p2708_p10 }
 0x21e   : > { %p2706_p9 = pneg %p2705_p7 }
 0x21f   : > { %p2712_p0 = por %p2711_p13, %p2710_p12 }
 0x221   : > { %p2713_p1 = pnand %p2712_p0, %p2706_p9 }
 0x223   : > { %2716 = shalt.err (!%p2713_p1)
}
 0x224   : > { %s2770_s17 = smov 128   ;;  %s2771_s25 = smov 8  }
 0x225   : > { %2623 = dma.vmem_to_hbm [thread:$0]  (%p2842_p4), %s4819_s24, 4096, %s4817_s29, %s4826_s21, %s2770_s17, %s2770_s17, %s2771_s25  }
 0x226 PF: > { %p2630_p2 = scmp.ge.s32.totalorder %s2767_s23, 2  ;;  %s2339_s27 = sand.u32 1, %s2747_s18  }
 0x227   : > { %s2340_s10 = scalar_lea.sflag [#allocation3], %s2339_s27 }
 0x228   : > { %p2626_p3 = pnand %p2630_p2, %p2849_p8 }
 0x22a   : > { %2742 = dma.done.wait (!%p2626_p3), %s2340_s10, 4096  }
 0x22b   : > { %2744 = vsyncadd (!%p2626_p3), %s2340_s10, 4294963200  ;;  %s18_s23 = sadd.s32 1, %s2767_s23   ;;  %s4904_s18 = smov %s2751_s19 }
 0x22c   : > { %p15_p5 = scmp.ge.s32.totalorder %s18_s23, 4   ;;  %s4905_s19 = smov %s2755_s20 }
 0x22d   : > { %s4906_s20 = smov %s2855_s6  ;;  %s4907_s21 = smov %s2763_s22 }
 0x22e   : > { %s4908_s22 = smov %s4910_s26  ;;  %17 = sbr.rel (!%p15_p5) target bundleno = 4 (0x4), region = 78 }
 0x235   :  { %2345 = vsyncpa [#allocation3], 1 }
 0x236   :  { %2347 = vsyncpa [#allocation3 + $0x1], 1 }

</bundles_post_ra>
